<compile_context>
chip_gen: v6e
topology: v6e:2x2x1
jax: 0.10.0
libtpu: 0.0.40
codegen_flags: <defaults>
</compile_context>

<pallas_src>
import jax
import jax.numpy as jnp
from jax.experimental import pallas as pl
from jax.experimental.pallas import tpu as pltpu

HIDDEN = 128
N_EMOJIS = 7      # len(emojis)
PAD_OUT = 128     # lane-dense padded output width


def _make_kernel(T, B):
    """Build the kernel with static T (seq len) and B (batch) baked in."""

    def kernel(x_ref, wih_ref, whh_ref, b_ref, wd_ref, bd_ref, out_ref):
        # ---- hoisted input projection: ONE (T*B, E) x (E, 4H) matmul, bias
        # folded in (single broadcast of b over all T*B rows).
        xg = (jnp.dot(x_ref[...], wih_ref[...],
                      preferred_element_type=jnp.float32)
              + b_ref[...])                       # (T*B, 4H)

        whh = whh_ref[...]                        # (H, 4H), loaded once

        # ---- recurrence: h, c live in vregs (one (8,128) vreg each),
        # fully unrolled over T, one MXU matmul per step.
        h = jnp.zeros((B, HIDDEN), jnp.float32)
        c = jnp.zeros((B, HIDDEN), jnp.float32)
        for t in range(T):                        # static, fully unrolled
            gates = (xg[t * B:(t + 1) * B, :]
                     + jnp.dot(h, whh, preferred_element_type=jnp.float32))
            i_g = jax.nn.sigmoid(gates[:, 0 * HIDDEN:1 * HIDDEN])
            f_g = jax.nn.sigmoid(gates[:, 1 * HIDDEN:2 * HIDDEN])
            g_g = jnp.tanh(gates[:, 2 * HIDDEN:3 * HIDDEN])
            o_g = jax.nn.sigmoid(gates[:, 3 * HIDDEN:4 * HIDDEN])
            c = f_g * c + i_g * g_g
            h = o_g * jnp.tanh(c)

        # ---- dense + softmax on lane-dense (B, 128) tile.
        # Padded columns carry bias -1e30 -> exp underflows to 0, so the
        # softmax over 128 lanes equals the softmax over the 7 real logits.
        logits = (jnp.dot(h, wd_ref[...], preferred_element_type=jnp.float32)
                  + bd_ref[...])                  # (B, 128)
        m = jnp.max(logits, axis=1, keepdims=True)
        e = jnp.exp(logits - m)
        out_ref[...] = e / jnp.sum(e, axis=1, keepdims=True)

    return kernel


def lstm_model_forward(x, params):
    """x: (B, T, E) float32 (batch_first, like the PyTorch module).
    Returns softmax probabilities (B, 7)."""
    B, T, E = x.shape

    # time-major, flattened to (T*B, E) for the batched input projection
    x_tm = jnp.transpose(x, (1, 0, 2)).reshape(T * B, E)

    # Pre-transpose weights so the kernel does plain row-major matmuls.
    wih = params["weight_ih"].T                                  # (E, 4H)
    whh = params["weight_hh"].T                                  # (H, 4H)
    b = (params["bias_ih"] + params["bias_hh"]).reshape(1, 4 * HIDDEN)

    # lane-dense padded dense layer: 7 -> 128 output lanes
    wd_pad = jnp.zeros((HIDDEN, PAD_OUT), jnp.float32)
    wd_pad = wd_pad.at[:, :N_EMOJIS].set(params["dense_w"].T)    # (H, 128)
    bd_pad = jnp.full((1, PAD_OUT), -1e30, jnp.float32)
    bd_pad = bd_pad.at[0, :N_EMOJIS].set(params["dense_b"])      # (1, 128)

    vmem = pl.BlockSpec(memory_space=pltpu.MemorySpace.VMEM)

    out_padded = pl.pallas_call(
        _make_kernel(T, B),
        out_shape=jax.ShapeDtypeStruct((B, PAD_OUT), jnp.float32),
        in_specs=[vmem] * 6,
        out_specs=vmem,
        compiler_params=pltpu.CompilerParams(
            vmem_limit_bytes=8 * 1024 * 1024),
    )(x_tm, wih, whh, b, wd_pad, bd_pad)

    return out_padded[:, :N_EMOJIS]


def init_params(key, encoding_size):
    """Deterministic synthetic init matching PyTorch parameter shapes."""
    ks = jax.random.split(key, 6)
    scale = 1.0 / jnp.sqrt(HIDDEN).astype(jnp.float32)
    return {
        "weight_ih": jax.random.uniform(ks[0], (4 * HIDDEN, encoding_size),
                                        jnp.float32, -scale, scale),
        "weight_hh": jax.random.uniform(ks[1], (4 * HIDDEN, HIDDEN),
                                        jnp.float32, -scale, scale),
        "bias_ih": jax.random.uniform(ks[2], (4 * HIDDEN,),
                                      jnp.float32, -scale, scale),
        "bias_hh": jax.random.uniform(ks[3], (4 * HIDDEN,),
                                      jnp.float32, -scale, scale),
        "dense_w": jax.random.uniform(ks[4], (N_EMOJIS, HIDDEN),
                                      jnp.float32, -scale, scale),
        "dense_b": jax.random.uniform(ks[5], (N_EMOJIS,),
                                      jnp.float32, -scale, scale),
    }


def reference_forward(x, params):
    """Pure-JAX reference (PyTorch LSTM semantics) for validation."""
    B, T, E = x.shape
    wih, whh = params["weight_ih"], params["weight_hh"]
    b = params["bias_ih"] + params["bias_hh"]
    h = jnp.zeros((B, HIDDEN), jnp.float32)
    c = jnp.zeros((B, HIDDEN), jnp.float32)
    for t in range(T):
        gates = x[:, t, :] @ wih.T + h @ whh.T + b
        i = jax.nn.sigmoid(gates[:, 0 * HIDDEN:1 * HIDDEN])
        f = jax.nn.sigmoid(gates[:, 1 * HIDDEN:2 * HIDDEN])
        g = jnp.tanh(gates[:, 2 * HIDDEN:3 * HIDDEN])
        o = jax.nn.sigmoid(gates[:, 3 * HIDDEN:4 * HIDDEN])
        c = f * c + i * g
        h = o * jnp.tanh(c)
    logits = h @ params["dense_w"].T + params["dense_b"]
    return jax.nn.softmax(logits, axis=1)


if __name__ == "__main__":
    B, T, E = 8, 8, 8  # batch, sequence length, encoding_size
    key = jax.random.PRNGKey(0)
    k_x, k_p = jax.random.split(key)
    # one-hot-like encoded input, as the original "cap"/"cat" sequences would be
    idx = jax.random.randint(k_x, (B, T), 0, E)
    x = jax.nn.one_hot(idx, E, dtype=jnp.float32)

    params = init_params(k_p, E)

    out = lstm_model_forward(x, params)
    out = jax.block_until_ready(out)

    ref = reference_forward(x, params)
    assert out.shape == (B, N_EMOJIS)
    assert jnp.allclose(out, ref, atol=1e-5, rtol=1e-5)

    print("KERNEL_OK")
</pallas_src>

<mosaic_0001>
module attributes {stable_mosaic.version = 11 : i64} {
  func.func @kernel(%arg0: memref<64x8xf32, #tpu.memory_space<vmem>>, %arg1: memref<8x512xf32, #tpu.memory_space<vmem>>, %arg2: memref<128x512xf32, #tpu.memory_space<vmem>>, %arg3: memref<1x512xf32, #tpu.memory_space<vmem>>, %arg4: memref<128x128xf32, #tpu.memory_space<vmem>>, %arg5: memref<1x128xf32, #tpu.memory_space<vmem>>, %arg6: memref<8x128xf32, #tpu.memory_space<vmem>>) attributes {dimension_semantics = [], scalar_prefetch = 0 : i64, scratch_operands = 0 : i64, tpu.core_type = #tpu.core_type<tc>} {
    %c0 = arith.constant 0 : index
    %c0_0 = arith.constant 0 : index
    %0 = vector.load %arg0[%c0, %c0_0] : memref<64x8xf32, #tpu.memory_space<vmem>>, vector<64x8xf32>
    %c0_1 = arith.constant 0 : index
    %c0_2 = arith.constant 0 : index
    %1 = vector.load %arg1[%c0_1, %c0_2] : memref<8x512xf32, #tpu.memory_space<vmem>>, vector<8x512xf32>
    %cst = arith.constant dense<0.000000e+00> : vector<64x512xf32>
    %2 = tpu.matmul %0, %1, %cst {dimension_numbers = #tpu.dot_dimension_numbers<[1], [0], [0], [1], [0, 0, 1, 1], [], []>} : vector<64x8xf32>, vector<8x512xf32>, vector<64x512xf32> -> vector<64x512xf32>
    %c0_3 = arith.constant 0 : index
    %c0_4 = arith.constant 0 : index
    %3 = vector.load %arg3[%c0_3, %c0_4] : memref<1x512xf32, #tpu.memory_space<vmem>>, vector<1x512xf32>
    %4 = vector.broadcast %3 : vector<1x512xf32> to vector<64x512xf32>
    %5 = arith.addf %2, %4 : vector<64x512xf32>
    %c0_5 = arith.constant 0 : index
    %c0_6 = arith.constant 0 : index
    %6 = vector.load %arg2[%c0_5, %c0_6] : memref<128x512xf32, #tpu.memory_space<vmem>>, vector<128x512xf32>
    %cst_7 = arith.constant 0.000000e+00 : f32
    %7 = vector.broadcast %cst_7 : f32 to vector<8x128xf32>
    %cst_8 = arith.constant 0.000000e+00 : f32
    %8 = vector.broadcast %cst_8 : f32 to vector<8x128xf32>
    %9 = vector.extract_strided_slice %5 {offsets = [0, 0], sizes = [8, 512], strides = [1, 1]} : vector<64x512xf32> to vector<8x512xf32>
    %cst_9 = arith.constant dense<0.000000e+00> : vector<8x512xf32>
    %10 = tpu.matmul %7, %6, %cst_9 {dimension_numbers = #tpu.dot_dimension_numbers<[1], [0], [0], [1], [0, 0, 1, 1], [], []>} : vector<8x128xf32>, vector<128x512xf32>, vector<8x512xf32> -> vector<8x512xf32>
    %11 = arith.addf %9, %10 : vector<8x512xf32>
    %12 = vector.extract_strided_slice %11 {offsets = [0, 0], sizes = [8, 128], strides = [1, 1]} : vector<8x512xf32> to vector<8x128xf32>
    %13 = arith.negf %12 : vector<8x128xf32>
    %14 = math.exp %13 : vector<8x128xf32>
    %cst_10 = arith.constant 1.000000e+00 : f32
    %15 = vector.broadcast %cst_10 : f32 to vector<8x128xf32>
    %16 = arith.addf %15, %14 : vector<8x128xf32>
    %17 = arith.divf %15, %16 : vector<8x128xf32>
    %18 = vector.extract_strided_slice %11 {offsets = [0, 128], sizes = [8, 128], strides = [1, 1]} : vector<8x512xf32> to vector<8x128xf32>
    %19 = arith.negf %18 : vector<8x128xf32>
    %20 = math.exp %19 : vector<8x128xf32>
    %cst_11 = arith.constant 1.000000e+00 : f32
    %21 = vector.broadcast %cst_11 : f32 to vector<8x128xf32>
    %22 = arith.addf %21, %20 : vector<8x128xf32>
    %23 = arith.divf %21, %22 : vector<8x128xf32>
    %24 = vector.extract_strided_slice %11 {offsets = [0, 256], sizes = [8, 128], strides = [1, 1]} : vector<8x512xf32> to vector<8x128xf32>
    %25 = math.tanh %24 : vector<8x128xf32>
    %26 = vector.extract_strided_slice %11 {offsets = [0, 384], sizes = [8, 128], strides = [1, 1]} : vector<8x512xf32> to vector<8x128xf32>
    %27 = arith.negf %26 : vector<8x128xf32>
    %28 = math.exp %27 : vector<8x128xf32>
    %cst_12 = arith.constant 1.000000e+00 : f32
    %29 = vector.broadcast %cst_12 : f32 to vector<8x128xf32>
    %30 = arith.addf %29, %28 : vector<8x128xf32>
    %31 = arith.divf %29, %30 : vector<8x128xf32>
    %32 = arith.mulf %23, %8 : vector<8x128xf32>
    %33 = arith.mulf %17, %25 : vector<8x128xf32>
    %34 = arith.addf %32, %33 : vector<8x128xf32>
    %35 = math.tanh %34 : vector<8x128xf32>
    %36 = arith.mulf %31, %35 : vector<8x128xf32>
    %37 = vector.extract_strided_slice %5 {offsets = [8, 0], sizes = [8, 512], strides = [1, 1]} : vector<64x512xf32> to vector<8x512xf32>
    %cst_13 = arith.constant dense<0.000000e+00> : vector<8x512xf32>
    %38 = tpu.matmul %36, %6, %cst_13 {dimension_numbers = #tpu.dot_dimension_numbers<[1], [0], [0], [1], [0, 0, 1, 1], [], []>} : vector<8x128xf32>, vector<128x512xf32>, vector<8x512xf32> -> vector<8x512xf32>
    %39 = arith.addf %37, %38 : vector<8x512xf32>
    %40 = vector.extract_strided_slice %39 {offsets = [0, 0], sizes = [8, 128], strides = [1, 1]} : vector<8x512xf32> to vector<8x128xf32>
    %41 = arith.negf %40 : vector<8x128xf32>
    %42 = math.exp %41 : vector<8x128xf32>
    %cst_14 = arith.constant 1.000000e+00 : f32
    %43 = vector.broadcast %cst_14 : f32 to vector<8x128xf32>
    %44 = arith.addf %43, %42 : vector<8x128xf32>
    %45 = arith.divf %43, %44 : vector<8x128xf32>
    %46 = vector.extract_strided_slice %39 {offsets = [0, 128], sizes = [8, 128], strides = [1, 1]} : vector<8x512xf32> to vector<8x128xf32>
    %47 = arith.negf %46 : vector<8x128xf32>
    %48 = math.exp %47 : vector<8x128xf32>
    %cst_15 = arith.constant 1.000000e+00 : f32
    %49 = vector.broadcast %cst_15 : f32 to vector<8x128xf32>
    %50 = arith.addf %49, %48 : vector<8x128xf32>
    %51 = arith.divf %49, %50 : vector<8x128xf32>
    %52 = vector.extract_strided_slice %39 {offsets = [0, 256], sizes = [8, 128], strides = [1, 1]} : vector<8x512xf32> to vector<8x128xf32>
    %53 = math.tanh %52 : vector<8x128xf32>
    %54 = vector.extract_strided_slice %39 {offsets = [0, 384], sizes = [8, 128], strides = [1, 1]} : vector<8x512xf32> to vector<8x128xf32>
    %55 = arith.negf %54 : vector<8x128xf32>
    %56 = math.exp %55 : vector<8x128xf32>
    %cst_16 = arith.constant 1.000000e+00 : f32
    %57 = vector.broadcast %cst_16 : f32 to vector<8x128xf32>
    %58 = arith.addf %57, %56 : vector<8x128xf32>
    %59 = arith.divf %57, %58 : vector<8x128xf32>
    %60 = arith.mulf %51, %34 : vector<8x128xf32>
    %61 = arith.mulf %45, %53 : vector<8x128xf32>
    %62 = arith.addf %60, %61 : vector<8x128xf32>
    %63 = math.tanh %62 : vector<8x128xf32>
    %64 = arith.mulf %59, %63 : vector<8x128xf32>
    %65 = vector.extract_strided_slice %5 {offsets = [16, 0], sizes = [8, 512], strides = [1, 1]} : vector<64x512xf32> to vector<8x512xf32>
    %cst_17 = arith.constant dense<0.000000e+00> : vector<8x512xf32>
    %66 = tpu.matmul %64, %6, %cst_17 {dimension_numbers = #tpu.dot_dimension_numbers<[1], [0], [0], [1], [0, 0, 1, 1], [], []>} : vector<8x128xf32>, vector<128x512xf32>, vector<8x512xf32> -> vector<8x512xf32>
    %67 = arith.addf %65, %66 : vector<8x512xf32>
    %68 = vector.extract_strided_slice %67 {offsets = [0, 0], sizes = [8, 128], strides = [1, 1]} : vector<8x512xf32> to vector<8x128xf32>
    %69 = arith.negf %68 : vector<8x128xf32>
    %70 = math.exp %69 : vector<8x128xf32>
    %cst_18 = arith.constant 1.000000e+00 : f32
    %71 = vector.broadcast %cst_18 : f32 to vector<8x128xf32>
    %72 = arith.addf %71, %70 : vector<8x128xf32>
    %73 = arith.divf %71, %72 : vector<8x128xf32>
    %74 = vector.extract_strided_slice %67 {offsets = [0, 128], sizes = [8, 128], strides = [1, 1]} : vector<8x512xf32> to vector<8x128xf32>
    %75 = arith.negf %74 : vector<8x128xf32>
    %76 = math.exp %75 : vector<8x128xf32>
    %cst_19 = arith.constant 1.000000e+00 : f32
    %77 = vector.broadcast %cst_19 : f32 to vector<8x128xf32>
    %78 = arith.addf %77, %76 : vector<8x128xf32>
    %79 = arith.divf %77, %78 : vector<8x128xf32>
    %80 = vector.extract_strided_slice %67 {offsets = [0, 256], sizes = [8, 128], strides = [1, 1]} : vector<8x512xf32> to vector<8x128xf32>
    %81 = math.tanh %80 : vector<8x128xf32>
    %82 = vector.extract_strided_slice %67 {offsets = [0, 384], sizes = [8, 128], strides = [1, 1]} : vector<8x512xf32> to vector<8x128xf32>
    %83 = arith.negf %82 : vector<8x128xf32>
    %84 = math.exp %83 : vector<8x128xf32>
    %cst_20 = arith.constant 1.000000e+00 : f32
    %85 = vector.broadcast %cst_20 : f32 to vector<8x128xf32>
    %86 = arith.addf %85, %84 : vector<8x128xf32>
    %87 = arith.divf %85, %86 : vector<8x128xf32>
    %88 = arith.mulf %79, %62 : vector<8x128xf32>
    %89 = arith.mulf %73, %81 : vector<8x128xf32>
    %90 = arith.addf %88, %89 : vector<8x128xf32>
    %91 = math.tanh %90 : vector<8x128xf32>
    %92 = arith.mulf %87, %91 : vector<8x128xf32>
    %93 = vector.extract_strided_slice %5 {offsets = [24, 0], sizes = [8, 512], strides = [1, 1]} : vector<64x512xf32> to vector<8x512xf32>
    %cst_21 = arith.constant dense<0.000000e+00> : vector<8x512xf32>
    %94 = tpu.matmul %92, %6, %cst_21 {dimension_numbers = #tpu.dot_dimension_numbers<[1], [0], [0], [1], [0, 0, 1, 1], [], []>} : vector<8x128xf32>, vector<128x512xf32>, vector<8x512xf32> -> vector<8x512xf32>
    %95 = arith.addf %93, %94 : vector<8x512xf32>
    %96 = vector.extract_strided_slice %95 {offsets = [0, 0], sizes = [8, 128], strides = [1, 1]} : vector<8x512xf32> to vector<8x128xf32>
    %97 = arith.negf %96 : vector<8x128xf32>
    %98 = math.exp %97 : vector<8x128xf32>
    %cst_22 = arith.constant 1.000000e+00 : f32
    %99 = vector.broadcast %cst_22 : f32 to vector<8x128xf32>
    %100 = arith.addf %99, %98 : vector<8x128xf32>
    %101 = arith.divf %99, %100 : vector<8x128xf32>
    %102 = vector.extract_strided_slice %95 {offsets = [0, 128], sizes = [8, 128], strides = [1, 1]} : vector<8x512xf32> to vector<8x128xf32>
    %103 = arith.negf %102 : vector<8x128xf32>
    %104 = math.exp %103 : vector<8x128xf32>
    %cst_23 = arith.constant 1.000000e+00 : f32
    %105 = vector.broadcast %cst_23 : f32 to vector<8x128xf32>
    %106 = arith.addf %105, %104 : vector<8x128xf32>
    %107 = arith.divf %105, %106 : vector<8x128xf32>
    %108 = vector.extract_strided_slice %95 {offsets = [0, 256], sizes = [8, 128], strides = [1, 1]} : vector<8x512xf32> to vector<8x128xf32>
    %109 = math.tanh %108 : vector<8x128xf32>
    %110 = vector.extract_strided_slice %95 {offsets = [0, 384], sizes = [8, 128], strides = [1, 1]} : vector<8x512xf32> to vector<8x128xf32>
    %111 = arith.negf %110 : vector<8x128xf32>
    %112 = math.exp %111 : vector<8x128xf32>
    %cst_24 = arith.constant 1.000000e+00 : f32
    %113 = vector.broadcast %cst_24 : f32 to vector<8x128xf32>
    %114 = arith.addf %113, %112 : vector<8x128xf32>
    %115 = arith.divf %113, %114 : vector<8x128xf32>
    %116 = arith.mulf %107, %90 : vector<8x128xf32>
    %117 = arith.mulf %101, %109 : vector<8x128xf32>
    %118 = arith.addf %116, %117 : vector<8x128xf32>
    %119 = math.tanh %118 : vector<8x128xf32>
    %120 = arith.mulf %115, %119 : vector<8x128xf32>
    %121 = vector.extract_strided_slice %5 {offsets = [32, 0], sizes = [8, 512], strides = [1, 1]} : vector<64x512xf32> to vector<8x512xf32>
    %cst_25 = arith.constant dense<0.000000e+00> : vector<8x512xf32>
    %122 = tpu.matmul %120, %6, %cst_25 {dimension_numbers = #tpu.dot_dimension_numbers<[1], [0], [0], [1], [0, 0, 1, 1], [], []>} : vector<8x128xf32>, vector<128x512xf32>, vector<8x512xf32> -> vector<8x512xf32>
    %123 = arith.addf %121, %122 : vector<8x512xf32>
    %124 = vector.extract_strided_slice %123 {offsets = [0, 0], sizes = [8, 128], strides = [1, 1]} : vector<8x512xf32> to vector<8x128xf32>
    %125 = arith.negf %124 : vector<8x128xf32>
    %126 = math.exp %125 : vector<8x128xf32>
    %cst_26 = arith.constant 1.000000e+00 : f32
    %127 = vector.broadcast %cst_26 : f32 to vector<8x128xf32>
    %128 = arith.addf %127, %126 : vector<8x128xf32>
    %129 = arith.divf %127, %128 : vector<8x128xf32>
    %130 = vector.extract_strided_slice %123 {offsets = [0, 128], sizes = [8, 128], strides = [1, 1]} : vector<8x512xf32> to vector<8x128xf32>
    %131 = arith.negf %130 : vector<8x128xf32>
    %132 = math.exp %131 : vector<8x128xf32>
    %cst_27 = arith.constant 1.000000e+00 : f32
    %133 = vector.broadcast %cst_27 : f32 to vector<8x128xf32>
    %134 = arith.addf %133, %132 : vector<8x128xf32>
    %135 = arith.divf %133, %134 : vector<8x128xf32>
    %136 = vector.extract_strided_slice %123 {offsets = [0, 256], sizes = [8, 128], strides = [1, 1]} : vector<8x512xf32> to vector<8x128xf32>
    %137 = math.tanh %136 : vector<8x128xf32>
    %138 = vector.extract_strided_slice %123 {offsets = [0, 384], sizes = [8, 128], strides = [1, 1]} : vector<8x512xf32> to vector<8x128xf32>
    %139 = arith.negf %138 : vector<8x128xf32>
    %140 = math.exp %139 : vector<8x128xf32>
    %cst_28 = arith.constant 1.000000e+00 : f32
    %141 = vector.broadcast %cst_28 : f32 to vector<8x128xf32>
    %142 = arith.addf %141, %140 : vector<8x128xf32>
    %143 = arith.divf %141, %142 : vector<8x128xf32>
    %144 = arith.mulf %135, %118 : vector<8x128xf32>
    %145 = arith.mulf %129, %137 : vector<8x128xf32>
    %146 = arith.addf %144, %145 : vector<8x128xf32>
    %147 = math.tanh %146 : vector<8x128xf32>
    %148 = arith.mulf %143, %147 : vector<8x128xf32>
    %149 = vector.extract_strided_slice %5 {offsets = [40, 0], sizes = [8, 512], strides = [1, 1]} : vector<64x512xf32> to vector<8x512xf32>
    %cst_29 = arith.constant dense<0.000000e+00> : vector<8x512xf32>
    %150 = tpu.matmul %148, %6, %cst_29 {dimension_numbers = #tpu.dot_dimension_numbers<[1], [0], [0], [1], [0, 0, 1, 1], [], []>} : vector<8x128xf32>, vector<128x512xf32>, vector<8x512xf32> -> vector<8x512xf32>
    %151 = arith.addf %149, %150 : vector<8x512xf32>
    %152 = vector.extract_strided_slice %151 {offsets = [0, 0], sizes = [8, 128], strides = [1, 1]} : vector<8x512xf32> to vector<8x128xf32>
    %153 = arith.negf %152 : vector<8x128xf32>
    %154 = math.exp %153 : vector<8x128xf32>
    %cst_30 = arith.constant 1.000000e+00 : f32
    %155 = vector.broadcast %cst_30 : f32 to vector<8x128xf32>
    %156 = arith.addf %155, %154 : vector<8x128xf32>
    %157 = arith.divf %155, %156 : vector<8x128xf32>
    %158 = vector.extract_strided_slice %151 {offsets = [0, 128], sizes = [8, 128], strides = [1, 1]} : vector<8x512xf32> to vector<8x128xf32>
    %159 = arith.negf %158 : vector<8x128xf32>
    %160 = math.exp %159 : vector<8x128xf32>
    %cst_31 = arith.constant 1.000000e+00 : f32
    %161 = vector.broadcast %cst_31 : f32 to vector<8x128xf32>
    %162 = arith.addf %161, %160 : vector<8x128xf32>
    %163 = arith.divf %161, %162 : vector<8x128xf32>
    %164 = vector.extract_strided_slice %151 {offsets = [0, 256], sizes = [8, 128], strides = [1, 1]} : vector<8x512xf32> to vector<8x128xf32>
    %165 = math.tanh %164 : vector<8x128xf32>
    %166 = vector.extract_strided_slice %151 {offsets = [0, 384], sizes = [8, 128], strides = [1, 1]} : vector<8x512xf32> to vector<8x128xf32>
    %167 = arith.negf %166 : vector<8x128xf32>
    %168 = math.exp %167 : vector<8x128xf32>
    %cst_32 = arith.constant 1.000000e+00 : f32
    %169 = vector.broadcast %cst_32 : f32 to vector<8x128xf32>
    %170 = arith.addf %169, %168 : vector<8x128xf32>
    %171 = arith.divf %169, %170 : vector<8x128xf32>
    %172 = arith.mulf %163, %146 : vector<8x128xf32>
    %173 = arith.mulf %157, %165 : vector<8x128xf32>
    %174 = arith.addf %172, %173 : vector<8x128xf32>
    %175 = math.tanh %174 : vector<8x128xf32>
    %176 = arith.mulf %171, %175 : vector<8x128xf32>
    %177 = vector.extract_strided_slice %5 {offsets = [48, 0], sizes = [8, 512], strides = [1, 1]} : vector<64x512xf32> to vector<8x512xf32>
    %cst_33 = arith.constant dense<0.000000e+00> : vector<8x512xf32>
    %178 = tpu.matmul %176, %6, %cst_33 {dimension_numbers = #tpu.dot_dimension_numbers<[1], [0], [0], [1], [0, 0, 1, 1], [], []>} : vector<8x128xf32>, vector<128x512xf32>, vector<8x512xf32> -> vector<8x512xf32>
    %179 = arith.addf %177, %178 : vector<8x512xf32>
    %180 = vector.extract_strided_slice %179 {offsets = [0, 0], sizes = [8, 128], strides = [1, 1]} : vector<8x512xf32> to vector<8x128xf32>
    %181 = arith.negf %180 : vector<8x128xf32>
    %182 = math.exp %181 : vector<8x128xf32>
    %cst_34 = arith.constant 1.000000e+00 : f32
    %183 = vector.broadcast %cst_34 : f32 to vector<8x128xf32>
    %184 = arith.addf %183, %182 : vector<8x128xf32>
    %185 = arith.divf %183, %184 : vector<8x128xf32>
    %186 = vector.extract_strided_slice %179 {offsets = [0, 128], sizes = [8, 128], strides = [1, 1]} : vector<8x512xf32> to vector<8x128xf32>
    %187 = arith.negf %186 : vector<8x128xf32>
    %188 = math.exp %187 : vector<8x128xf32>
    %cst_35 = arith.constant 1.000000e+00 : f32
    %189 = vector.broadcast %cst_35 : f32 to vector<8x128xf32>
    %190 = arith.addf %189, %188 : vector<8x128xf32>
    %191 = arith.divf %189, %190 : vector<8x128xf32>
    %192 = vector.extract_strided_slice %179 {offsets = [0, 256], sizes = [8, 128], strides = [1, 1]} : vector<8x512xf32> to vector<8x128xf32>
    %193 = math.tanh %192 : vector<8x128xf32>
    %194 = vector.extract_strided_slice %179 {offsets = [0, 384], sizes = [8, 128], strides = [1, 1]} : vector<8x512xf32> to vector<8x128xf32>
    %195 = arith.negf %194 : vector<8x128xf32>
    %196 = math.exp %195 : vector<8x128xf32>
    %cst_36 = arith.constant 1.000000e+00 : f32
    %197 = vector.broadcast %cst_36 : f32 to vector<8x128xf32>
    %198 = arith.addf %197, %196 : vector<8x128xf32>
    %199 = arith.divf %197, %198 : vector<8x128xf32>
    %200 = arith.mulf %191, %174 : vector<8x128xf32>
    %201 = arith.mulf %185, %193 : vector<8x128xf32>
    %202 = arith.addf %200, %201 : vector<8x128xf32>
    %203 = math.tanh %202 : vector<8x128xf32>
    %204 = arith.mulf %199, %203 : vector<8x128xf32>
    %205 = vector.extract_strided_slice %5 {offsets = [56, 0], sizes = [8, 512], strides = [1, 1]} : vector<64x512xf32> to vector<8x512xf32>
    %cst_37 = arith.constant dense<0.000000e+00> : vector<8x512xf32>
    %206 = tpu.matmul %204, %6, %cst_37 {dimension_numbers = #tpu.dot_dimension_numbers<[1], [0], [0], [1], [0, 0, 1, 1], [], []>} : vector<8x128xf32>, vector<128x512xf32>, vector<8x512xf32> -> vector<8x512xf32>
    %207 = arith.addf %205, %206 : vector<8x512xf32>
    %208 = vector.extract_strided_slice %207 {offsets = [0, 0], sizes = [8, 128], strides = [1, 1]} : vector<8x512xf32> to vector<8x128xf32>
    %209 = arith.negf %208 : vector<8x128xf32>
    %210 = math.exp %209 : vector<8x128xf32>
    %cst_38 = arith.constant 1.000000e+00 : f32
    %211 = vector.broadcast %cst_38 : f32 to vector<8x128xf32>
    %212 = arith.addf %211, %210 : vector<8x128xf32>
    %213 = arith.divf %211, %212 : vector<8x128xf32>
    %214 = vector.extract_strided_slice %207 {offsets = [0, 128], sizes = [8, 128], strides = [1, 1]} : vector<8x512xf32> to vector<8x128xf32>
    %215 = arith.negf %214 : vector<8x128xf32>
    %216 = math.exp %215 : vector<8x128xf32>
    %cst_39 = arith.constant 1.000000e+00 : f32
    %217 = vector.broadcast %cst_39 : f32 to vector<8x128xf32>
    %218 = arith.addf %217, %216 : vector<8x128xf32>
    %219 = arith.divf %217, %218 : vector<8x128xf32>
    %220 = vector.extract_strided_slice %207 {offsets = [0, 256], sizes = [8, 128], strides = [1, 1]} : vector<8x512xf32> to vector<8x128xf32>
    %221 = math.tanh %220 : vector<8x128xf32>
    %222 = vector.extract_strided_slice %207 {offsets = [0, 384], sizes = [8, 128], strides = [1, 1]} : vector<8x512xf32> to vector<8x128xf32>
    %223 = arith.negf %222 : vector<8x128xf32>
    %224 = math.exp %223 : vector<8x128xf32>
    %cst_40 = arith.constant 1.000000e+00 : f32
    %225 = vector.broadcast %cst_40 : f32 to vector<8x128xf32>
    %226 = arith.addf %225, %224 : vector<8x128xf32>
    %227 = arith.divf %225, %226 : vector<8x128xf32>
    %228 = arith.mulf %219, %202 : vector<8x128xf32>
    %229 = arith.mulf %213, %221 : vector<8x128xf32>
    %230 = arith.addf %228, %229 : vector<8x128xf32>
    %231 = math.tanh %230 : vector<8x128xf32>
    %232 = arith.mulf %227, %231 : vector<8x128xf32>
    %c0_41 = arith.constant 0 : index
    %c0_42 = arith.constant 0 : index
    %233 = vector.load %arg4[%c0_41, %c0_42] : memref<128x128xf32, #tpu.memory_space<vmem>>, vector<128x128xf32>
    %cst_43 = arith.constant dense<0.000000e+00> : vector<8x128xf32>
    %234 = tpu.matmul %232, %233, %cst_43 {dimension_numbers = #tpu.dot_dimension_numbers<[1], [0], [0], [1], [0, 0, 1, 1], [], []>} : vector<8x128xf32>, vector<128x128xf32>, vector<8x128xf32> -> vector<8x128xf32>
    %c0_44 = arith.constant 0 : index
    %c0_45 = arith.constant 0 : index
    %235 = vector.load %arg5[%c0_44, %c0_45] : memref<1x128xf32, #tpu.memory_space<vmem>>, vector<1x128xf32>
    %236 = vector.broadcast %235 : vector<1x128xf32> to vector<8x128xf32>
    %237 = arith.addf %234, %236 : vector<8x128xf32>
    %cst_46 = arith.constant dense<0xFF800000> : vector<8xf32>
    %238 = vector.multi_reduction <maximumf>, %237, %cst_46 [1] : vector<8x128xf32> to vector<8xf32>
    %239 = vector.shape_cast %238 : vector<8xf32> to vector<8x1xf32>
    %240 = vector.broadcast %239 : vector<8x1xf32> to vector<8x128xf32>
    %241 = arith.subf %237, %240 : vector<8x128xf32>
    %242 = math.exp %241 : vector<8x128xf32>
    %cst_47 = arith.constant dense<0.000000e+00> : vector<8xf32>
    %243 = vector.multi_reduction <add>, %242, %cst_47 [1] : vector<8x128xf32> to vector<8xf32>
    %244 = vector.shape_cast %243 : vector<8xf32> to vector<8x1xf32>
    %245 = vector.broadcast %244 : vector<8x1xf32> to vector<8x128xf32>
    %246 = arith.divf %242, %245 : vector<8x128xf32>
    %c0_48 = arith.constant 0 : index
    %c0_49 = arith.constant 0 : index
    %247 = vector.load %arg6[%c0_48, %c0_49] : memref<8x128xf32, #tpu.memory_space<vmem>>, vector<8x128xf32>
    tpu.vector_store %arg6[%c0_48, %c0_49], %246 {strides = array<i32>} : memref<8x128xf32, #tpu.memory_space<vmem>>, vector<8x128xf32>,
    return
  }
}

</mosaic_0001>

<bundles_post_ra>
// kernel: tpu_custom_call.1
= control target key start
LH: loop header
LB: loop body
LE: loop exit
PB: predicated region body
PF: predicated region fallthrough
CT: control target
= control target key end

     0   :  { %11 = vsyncpa [#allocation3], 0  ;;  %s3318_s0 = inlined_call_operand.vmem [shape: f32[64,8], index: 0, kind: input, shape index: {}]   ;;  %s3319_s1 = inlined_call_operand.vmem [shape: f32[8,512], index: 1, kind: input, shape index: {}]   ;;  %s3320_s2 = inlined_call_operand.hbm [shape: f32[128,512], index: 2, kind: input, shape index: {}]   ;;  %s3321_s3 = inlined_call_operand.vmem [shape: f32[1,512], index: 3, kind: input, shape index: {}]   ;;  %s3322_s4 = inlined_call_operand.hbm [shape: f32[128,128], index: 4, kind: input, shape index: {}]   ;;  %s3323_s5 = inlined_call_operand.vmem [shape: f32[1,128], index: 5, kind: input, shape index: {}]   ;;  %s3324_s6 = inlined_call_operand.hbm [shape: f32[8,128], index: 6, kind: output, shape index: {}]  }
   0x1   :  { %12 = vsyncpa [#allocation6], 0 }
   0x2   :  { %13 = vsyncpa [#allocation4], 0  ;;  %s2244_s21 = smov [#allocation2]  }
   0x3   :  { %s23_s22 = sshll.u32 %s2244_s21, 4  ;;  %s24_s22 = int_to_ptr.vmem [resolvable:$true] %s23_s22 }
   0x4   :  { %s2186_s23 = scalar_lea.vmem %s24_s22, 8192  ;;  %p2191_p1 = scmp.lt.s32.totalorder %s24_s22, %s24_s22 }
   0x5   :  { %p2187_p0 = scmp.ne.s32.totalorder %s24_s22, %s2186_s23  ;;  %p2192_p2 = scmp.lt.s32.totalorder %s2186_s23, %s2186_s23 }
   0x7   :  { %p2193_p3 = por %p2192_p2, %p2191_p1 }
   0x9   :  { %p2194_p4 = pnand %p2193_p3, %p2187_p0 }
   0xb   :  { %2197 = shalt.err (!%p2194_p4)
}
   0xc   :  { %s2245_s24 = smov 512   ;;  %s2246_s25 = smov 32  }
   0xd   :  { %29 = dma.hbm_to_vmem [thread:$0]  %s3320_s2, 8192, %s24_s22, [#allocation3], %s2245_s24, %s2245_s24, %s2246_s25  }
   0xe   :  { %s2247_s28 = smov [#allocation5]  }
   0xf   :  { %s37_s29 = sshll.u32 %s2247_s28, 4  ;;  %s38_s29 = int_to_ptr.vmem [resolvable:$true] %s37_s29 }
  0x10   :  { %s2206_s30 = scalar_lea.vmem %s38_s29, 2048  ;;  %p2211_p6 = scmp.lt.s32.totalorder %s38_s29, %s38_s29 }
  0x11   :  { %p2207_p5 = scmp.ne.s32.totalorder %s38_s29, %s2206_s30  ;;  %p2212_p7 = scmp.lt.s32.totalorder %s2206_s30, %s2206_s30 }
  0x13   :  { %p2213_p8 = por %p2212_p7, %p2211_p6 }
  0x15   :  { %p2214_p9 = pnand %p2213_p8, %p2207_p5 }
  0x17   :  { %2217 = shalt.err (!%p2214_p9)
}
  0x18   :  { %s2248_s7 = smov 128   ;;  %s2249_s8 = smov 8  }
  0x19   :  { %43 = dma.hbm_to_vmem [thread:$0]  %s3322_s4, 2048, %s38_s29, [#allocation6], %s2248_s7, %s2248_s7, %s2249_s8  }
  0x1a   :  { %2238 = dma.done.wait [#allocation3], 8192  }
  0x1b   :  { %2239 = vsyncadd [#allocation3], 4294959104 }
  0x1c   :  { %2240 = dma.done.wait [#allocation6], 2048  }
  0x1d   :  { %2241 = vsyncadd [#allocation6], 4294965248  ;;  %v3325_v0 = vmov 0.0   ;;  %v61_v1 = vld [vmem:[%s3319_s1 + $0x8] sm:$0xff]  ;;  %v63_v2 = vld [vmem:[%s3319_s1 + $0x18] sm:$0xff]  ;;  %vm86_vm0 = vcmask 64512  }
  0x1e   :  { %175 = vmatprep.mubr.f32.mxu0 %v3325_v0  ;;  %288 = vmatprep.mubr.f32.mxu1 %v3325_v0  ;;  %v60_v3 = vld [vmem:[%s3319_s1] sm:$0xff]  ;;  %v62_v4 = vld [vmem:[%s3319_s1 + $0x10] sm:$0xff]  ;;  %v2311_v6 = vld [vmem:[#allocation2 + $0x1e8] sm:$0xff]  ;;  %vm2251_vm1 = vmmov 0   ;;  %s2252_s10 = smov [#allocation7]  }
  0x1f   :  { %141 = vmatprep.subr.mxu0 %v61_v1  ;;  %254 = vmatprep.subr.mxu1 %v63_v2  ;;  %v52_v5 = vld [vmem:[%s3318_s0] sm:$0xff]  ;;  %3413 = vst [vmem:[#allocation11_spill] sm:$0xff] %v2311_v6  ;;  %v2313_v7 = vld [vmem:[#allocation2 + $0x1f8] sm:$0xff]  ;;  %v2317_v9 = vld [vmem:[#allocation2 + $0x1f0] sm:$0xff]  ;;  %s1870_s2 = sshll.u32 %s2252_s10, 4  ;;  %s1871_s2 = int_to_ptr.vmem [resolvable:$true] %s1870_s2 }
  0x20   :  { %142 = vmatpush1.msra.mxu0 %v60_v3  ;;  %255 = vmatpush1.msra.mxu1 %v62_v4  ;;  %3414 = vst [vmem:[#allocation12_spill] sm:$0xff] %v2313_v7  ;;  %v2315_v8 = vld [vmem:[#allocation2 + $0x1e0] sm:$0xff]  ;;  %v2321_v10 = vld [vmem:[#allocation2 + $0x1c8] sm:$0xff]  ;;  %v2323_v11 = vld [vmem:[#allocation2 + $0x1d8] sm:$0xff]  ;;  %s2218_s11 = scalar_lea.vmem %s1871_s2, 128  ;;  %p2223_p11 = scmp.lt.s32.totalorder %s1871_s2, %s1871_s2 }
  0x21   :  { %1880 = vmatmul.mubr.msk.f32.vlgmr.msra.gmra.mxu0 %vm86_vm0, %v52_v5  ;;  %1888 = vmatmul.mubr.msk.f32.vlgmr.msra.gmra.mxu1 %vm86_vm0, %v52_v5  ;;  %v2329_v12 = vld [vmem:[#allocation2 + $0x1c0] sm:$0xff]  ;;  %v2331_v13 = vld [vmem:[#allocation2 + $0x1d0] sm:$0xff]  ;;  %v53_v14 = vld [vmem:[%s3318_s0 + $0x8] sm:$0xff]  ;;  %p2219_p10 = scmp.ne.s32.totalorder %s1871_s2, %s2218_s11  ;;  %p2224_p12 = scmp.lt.s32.totalorder %s2218_s11, %s2218_s11 }
  0x22   :  { %401 = vmatprep.subr.mxu0 %v2311_v6  ;;  %472 = vmatprep.subr.mxu1 %v2313_v7  ;;  %v2340_v15 = vld [vmem:[#allocation2 + $0x1a8] sm:$0xff]  ;;  %v2342_v16 = vld [vmem:[#allocation2 + $0x1b8] sm:$0xff]  ;;  %v2346_v17 = vld [vmem:[#allocation2 + $0x1a0] sm:$0xff] }
  0x23   :  { %402 = vmatpush1.msra.mxu0 %v2315_v8  ;;  %473 = vmatpush1.msra.mxu1 %v2317_v9  ;;  %v2348_v18 = vld [vmem:[#allocation2 + $0x1b0] sm:$0xff]  ;;  %v2352_v19 = vld [vmem:[#allocation2 + $0x188] sm:$0xff]  ;;  %v2354_v20 = vld [vmem:[#allocation2 + $0x198] sm:$0xff]  ;;  %p2225_p13 = por %p2224_p12, %p2223_p11 }
  0x24   :  { %403 = vmatprep.subr.mxu0 %v2321_v10  ;;  %474 = vmatprep.subr.mxu1 %v2323_v11  ;;  %v2360_v21 = vld [vmem:[#allocation2 + $0x180] sm:$0xff]  ;;  %v2362_v22 = vld [vmem:[#allocation2 + $0x190] sm:$0xff]  ;;  %v2371_v24 = vld [vmem:[#allocation2 + $0x168] sm:$0xff] }
  0x25   :  { %181 = vmatprep.mubr.f32.mxu0 %v3325_v0  ;;  %294 = vmatprep.mubr.f32.mxu1 %v3325_v0  ;;  %v54_v23 = vld [vmem:[%s3318_s0 + $0x10] sm:$0xff]  ;;  %v2373_v25 = vld [vmem:[#allocation2 + $0x178] sm:$0xff]  ;;  %v2377_v26 = vld [vmem:[#allocation2 + $0x160] sm:$0xff]  ;;  %p2226_p0 = pnand %p2225_p13, %p2219_p10 }
  0x26   :  { %404 = vmatpush1.msra.mxu0 %v2329_v12  ;;  %475 = vmatpush1.msra.mxu1 %v2331_v13  ;;  %v2379_v27 = vld [vmem:[#allocation2 + $0x170] sm:$0xff]  ;;  %v2383_v28 = vld [vmem:[#allocation2 + $0x148] sm:$0xff]  ;;  %v2385_v29 = vld [vmem:[#allocation2 + $0x158] sm:$0xff] }
  0x27   :  { %1881 = vmatmul.mubr.msk.f32.gmra.mxu0 %vm86_vm0, %v53_v14  ;;  %1889 = vmatmul.mubr.msk.f32.gmra.mxu1 %vm86_vm0, %v53_v14  ;;  %v2391_v30 = vld [vmem:[#allocation2 + $0x140] sm:$0xff]  ;;  %v2393_v31 = vld [vmem:[#allocation2 + $0x150] sm:$0xff]  ;;  %v55_v32 = vld [vmem:[%s3318_s0 + $0x18] sm:$0xff] }
  0x28   :  { %405 = vmatprep.subr.mxu0 %v2340_v15  ;;  %476 = vmatprep.subr.mxu1 %v2342_v16  ;;  %v2402_v33 = vld [vmem:[#allocation2 + $0x128] sm:$0xff]  ;;  %v2404_v34 = vld [vmem:[#allocation2 + $0x138] sm:$0xff]  ;;  %v2408_v35 = vld [vmem:[#allocation2 + $0x120] sm:$0xff] }
  0x29   :  { %406 = vmatpush1.msra.mxu0 %v2346_v17  ;;  %477 = vmatpush1.msra.mxu1 %v2348_v18  ;;  %v2410_v36 = vld [vmem:[#allocation2 + $0x130] sm:$0xff]  ;;  %v2414_v37 = vld [vmem:[#allocation2 + $0x108] sm:$0xff]  ;;  %v2416_v38 = vld [vmem:[#allocation2 + $0x118] sm:$0xff] }
  0x2a   :  { %407 = vmatprep.subr.mxu0 %v2352_v19  ;;  %478 = vmatprep.subr.mxu1 %v2354_v20  ;;  %v2422_v39 = vld [vmem:[#allocation2 + $0x100] sm:$0xff]  ;;  %v2424_v40 = vld [vmem:[#allocation2 + $0x110] sm:$0xff]  ;;  %v2433_v42 = vld [vmem:[#allocation2 + $0xe8] sm:$0xff] }
  0x2b   :  { %187 = vmatprep.mubr.f32.mxu0 %v3325_v0  ;;  %300 = vmatprep.mubr.f32.mxu1 %v3325_v0  ;;  %v56_v41 = vld [vmem:[%s3318_s0 + $0x20] sm:$0xff]  ;;  %v2435_v43 = vld [vmem:[#allocation2 + $0xf8] sm:$0xff]  ;;  %v2441_v45 = vld [vmem:[#allocation2 + $0xf0] sm:$0xff] }
  0x2c   :  { %408 = vmatpush1.msra.mxu0 %v2360_v21  ;;  %479 = vmatpush1.msra.mxu1 %v2362_v22  ;;  %v2439_v44 = vld [vmem:[#allocation2 + $0xe0] sm:$0xff]  ;;  %v2445_v46 = vld [vmem:[#allocation2 + $0xc8] sm:$0xff]  ;;  %v2447_v47 = vld [vmem:[#allocation2 + $0xd8] sm:$0xff] }
  0x2d   :  { %1882 = vmatmul.mubr.msk.f32.gmra.mxu0 %vm86_vm0, %v54_v23  ;;  %1890 = vmatmul.mubr.msk.f32.gmra.mxu1 %vm86_vm0, %v54_v23  ;;  %v2453_v48 = vld [vmem:[#allocation2 + $0xc0] sm:$0xff]  ;;  %v2455_v49 = vld [vmem:[#allocation2 + $0xd0] sm:$0xff]  ;;  %v57_v50 = vld [vmem:[%s3318_s0 + $0x28] sm:$0xff] }
  0x2e   :  { %409 = vmatprep.subr.mxu0 %v2371_v24  ;;  %480 = vmatprep.subr.mxu1 %v2373_v25  ;;  %v2464_v51 = vld [vmem:[#allocation2 + $0xa8] sm:$0xff]  ;;  %v2466_v52 = vld [vmem:[#allocation2 + $0xb8] sm:$0xff]  ;;  %v2470_v53 = vld [vmem:[#allocation2 + $0xa0] sm:$0xff] }
  0x2f   :  { %410 = vmatpush1.msra.mxu0 %v2377_v26  ;;  %481 = vmatpush1.msra.mxu1 %v2379_v27  ;;  %v2472_v54 = vld [vmem:[#allocation2 + $0xb0] sm:$0xff]  ;;  %v2476_v55 = vld [vmem:[#allocation2 + $0x88] sm:$0xff]  ;;  %v2478_v56 = vld [vmem:[#allocation2 + $0x98] sm:$0xff] }
  0x30   :  { %411 = vmatprep.subr.mxu0 %v2383_v28  ;;  %482 = vmatprep.subr.mxu1 %v2385_v29  ;;  %3415 = vst [vmem:[#allocation13_spill] sm:$0xff] %v2476_v55  ;;  %3416 = vst [vmem:[#allocation14_spill] sm:$0xff] %v2478_v56  ;;  %v2484_v57 = vld [vmem:[#allocation2 + $0x80] sm:$0xff]  ;;  %v2486_v58 = vld [vmem:[#allocation2 + $0x90] sm:$0xff] }
  0x31   :  { %193 = vmatprep.mubr.f32.mxu0 %v3325_v0  ;;  %306 = vmatprep.mubr.f32.mxu1 %v3325_v0  ;;  %3417 = vst [vmem:[#allocation15_spill] sm:$0xff] %v2484_v57  ;;  %3418 = vst [vmem:[#allocation16_spill] sm:$0xff] %v2486_v58  ;;  %v58_v59 = vld [vmem:[%s3318_s0 + $0x30] sm:$0xff]  ;;  %v2495_v60 = vld [vmem:[#allocation2 + $0x68] sm:$0xff] }
  0x32   :  { %412 = vmatpush1.msra.mxu0 %v2391_v30  ;;  %483 = vmatpush1.msra.mxu1 %v2393_v31  ;;  %3419 = vst [vmem:[#allocation17_spill] sm:$0xff] %v2495_v60  ;;  %v2497_v61 = vld [vmem:[#allocation2 + $0x78] sm:$0xff]  ;;  %v2501_v62 = vld [vmem:[#allocation2 + $0x60] sm:$0xff]  ;;  %v2503_v63 = vld [vmem:[#allocation2 + $0x70] sm:$0xff] }
  0x33   :  { %1883 = vmatmul.mubr.msk.f32.gmra.mxu0 %vm86_vm0, %v55_v32  ;;  %1891 = vmatmul.mubr.msk.f32.gmra.mxu1 %vm86_vm0, %v55_v32  ;;  %3420 = vst [vmem:[#allocation18_spill] sm:$0xff] %v2497_v61  ;;  %3421 = vst [vmem:[#allocation19_spill] sm:$0xff] %v2501_v62  ;;  %v2507_v1 = vld [vmem:[#allocation2 + $0x48] sm:$0xff]  ;;  %v2509_v2 = vld [vmem:[#allocation2 + $0x58] sm:$0xff] }
  0x34   :  { %413 = vmatprep.subr.mxu0 %v2402_v33  ;;  %484 = vmatprep.subr.mxu1 %v2404_v34  ;;  %3422 = vst [vmem:[#allocation20_spill] sm:$0xff] %v2503_v63  ;;  %3423 = vst [vmem:[#allocation21_spill] sm:$0xff] %v2507_v1  ;;  %v2515_v3 = vld [vmem:[#allocation2 + $0x40] sm:$0xff]  ;;  %v2517_v4 = vld [vmem:[#allocation2 + $0x50] sm:$0xff] }
  0x35   :  { %414 = vmatpush1.msra.mxu0 %v2408_v35  ;;  %485 = vmatpush1.msra.mxu1 %v2410_v36  ;;  %3424 = vst [vmem:[#allocation22_spill] sm:$0xff] %v2509_v2  ;;  %3425 = vst [vmem:[#allocation23_spill] sm:$0xff] %v2515_v3  ;;  %v59_v5 = vld [vmem:[%s3318_s0 + $0x38] sm:$0xff]  ;;  %v2526_v14 = vld [vmem:[#allocation2 + $0x28] sm:$0xff] }
  0x36   :  { %415 = vmatprep.subr.mxu0 %v2414_v37  ;;  %486 = vmatprep.subr.mxu1 %v2416_v38  ;;  %3426 = vst [vmem:[#allocation24_spill] sm:$0xff] %v2517_v4  ;;  %3427 = vst [vmem:[#allocation25_spill] sm:$0xff] %v2526_v14  ;;  %v2528_v23 = vld [vmem:[#allocation2 + $0x38] sm:$0xff]  ;;  %v2532_v32 = vld [vmem:[#allocation2 + $0x20] sm:$0xff] }
  0x37   :  { %199 = vmatprep.mubr.f32.mxu0 %v3325_v0  ;;  %312 = vmatprep.mubr.f32.mxu1 %v3325_v0  ;;  %3428 = vst [vmem:[#allocation26_spill] sm:$0xff] %v2528_v23  ;;  %3429 = vst [vmem:[#allocation27_spill] sm:$0xff] %v2532_v32 }
  0x38   :  { %416 = vmatpush1.msra.mxu0 %v2422_v39  ;;  %487 = vmatpush1.msra.mxu1 %v2424_v40 }
  0x39   :  { %1884 = vmatmul.mubr.msk.f32.gmra.mxu0 %vm86_vm0, %v56_v41  ;;  %1892 = vmatmul.mubr.msk.f32.gmra.mxu1 %vm86_vm0, %v56_v41  ;;  %v2534_v41 = vld [vmem:[#allocation2 + $0x30] sm:$0xff] }
  0x3a   :  { %417 = vmatprep.subr.mxu0 %v2433_v42  ;;  %488 = vmatprep.subr.mxu1 %v2435_v43  ;;  %3430 = vst [vmem:[#allocation28_spill] sm:$0xff] %v2534_v41 }
  0x3b   :  { %418 = vmatpush1.msra.mxu0 %v2439_v44  ;;  %489 = vmatpush1.msra.mxu1 %v2441_v45 }
  0x3c   :  { %419 = vmatprep.subr.mxu0 %v2445_v46  ;;  %490 = vmatprep.subr.mxu1 %v2447_v47 }
  0x3d   :  { %205 = vmatprep.mubr.f32.mxu0 %v3325_v0  ;;  %318 = vmatprep.mubr.f32.mxu1 %v3325_v0 }
  0x3e   :  { %420 = vmatpush1.msra.mxu0 %v2453_v48  ;;  %491 = vmatpush1.msra.mxu1 %v2455_v49 }
  0x3f   :  { %1885 = vmatmul.mubr.msk.f32.gmra.mxu0 %vm86_vm0, %v57_v50  ;;  %1893 = vmatmul.mubr.msk.f32.gmra.mxu1 %vm86_vm0, %v57_v50  ;;  %v2538_v50 = vld [vmem:[#allocation2 + $0x8] sm:$0xff] }
  0x40   :  { %421 = vmatprep.subr.mxu0 %v2464_v51  ;;  %492 = vmatprep.subr.mxu1 %v2466_v52  ;;  %3431 = vst [vmem:[#allocation29_spill] sm:$0xff] %v2538_v50 }
  0x41   :  { %422 = vmatpush1.msra.mxu0 %v2470_v53  ;;  %493 = vmatpush1.msra.mxu1 %v2472_v54 }
  0x42   :  { %423 = vmatprep.subr.mxu0 %v2476_v55  ;;  %494 = vmatprep.subr.mxu1 %v2478_v56 }
  0x43   :  { %211 = vmatprep.mubr.f32.mxu0 %v3325_v0  ;;  %324 = vmatprep.mubr.f32.mxu1 %v3325_v0 }
  0x44   :  { %424 = vmatpush1.msra.mxu0 %v2484_v57  ;;  %495 = vmatpush1.msra.mxu1 %v2486_v58 }
  0x45   :  { %1886 = vmatmul.mubr.msk.f32.gmra.mxu0 %vm86_vm0, %v58_v59  ;;  %1894 = vmatmul.mubr.msk.f32.gmra.mxu1 %vm86_vm0, %v58_v59  ;;  %v2540_v59 = vld [vmem:[#allocation2 + $0x18] sm:$0xff] }
  0x46   :  { %425 = vmatprep.subr.mxu0 %v2495_v60  ;;  %496 = vmatprep.subr.mxu1 %v2497_v61  ;;  %3432 = vst [vmem:[#allocation30_spill] sm:$0xff] %v2540_v59 }
  0x47   :  { %426 = vmatpush1.msra.mxu0 %v2501_v62  ;;  %497 = vmatpush1.msra.mxu1 %v2503_v63 }
  0x48   :  { %427 = vmatprep.subr.mxu0 %v2507_v1  ;;  %498 = vmatprep.subr.mxu1 %v2509_v2 }
  0x49   :  { %217 = vmatprep.mubr.f32.mxu0 %v3325_v0  ;;  %330 = vmatprep.mubr.f32.mxu1 %v3325_v0  ;;  %v2544_v0 = vld [vmem:[#allocation2] sm:$0xff] }
  0x4a   :  { %428 = vmatpush1.msra.mxu0 %v2515_v3  ;;  %499 = vmatpush1.msra.mxu1 %v2517_v4  ;;  %3433 = vst [vmem:[#allocation31_spill] sm:$0xff] %v2544_v0  ;;  %v2548_v4 = vld [vmem:[#allocation2 + $0x10] sm:$0xff] }
  0x4b   :  { %1887 = vmatmul.mubr.msk.f32.gmra.mxu0 %vm86_vm0, %v59_v5  ;;  %1895 = vmatmul.mubr.msk.f32.gmra.mxu1 %vm86_vm0, %v59_v5  ;;  %3434 = vst [vmem:[#allocation32_spill] sm:$0xff] %v2548_v4  ;;  %v3435_v5 = vmov 0.0  }
  0x4c   :  { %429 = vmatprep.subr.mxu0 %v2526_v14  ;;  %500 = vmatprep.subr.mxu1 %v2528_v23 }
  0x4d   :  { %430 = vmatpush1.msra.mxu0 %v2532_v32  ;;  %501 = vmatpush1.msra.mxu1 %v2534_v41 }
  0x4e   :  { %431 = vmatprep.subr.mxu0 %v2538_v50  ;;  %502 = vmatprep.subr.mxu1 %v2540_v59 }
  0x4f   :  { %432 = vmatpush1.msra.mxu0 %v2544_v0  ;;  %465 = vmatprep.mubr.f32.mxu0 %v3435_v5 }
  0x50   :  { %503 = vmatpush1.msra.mxu1 %v2548_v4  ;;  %536 = vmatprep.mubr.f32.mxu1 %v3435_v5 }
  0x51   :  { %466 = vmatmul.mubr.f32.vlgmr.msra.gmra.mxu0 %v3435_v5  ;;  %537 = vmatmul.mubr.f32.vlgmr.msra.gmra.mxu1 %v3435_v5 }
  0x52   :  { %571 = vmatprep.subr.mxu0 %v2311_v6  ;;  %642 = vmatprep.subr.mxu1 %v2313_v7 }
  0x53   :  { %572 = vmatpush1.msra.mxu0 %v2315_v8  ;;  %643 = vmatpush1.msra.mxu1 %v2317_v9 }
  0x54   :  { %573 = vmatprep.subr.mxu0 %v2321_v10  ;;  %644 = vmatprep.subr.mxu1 %v2323_v11 }
  0x55   :  { %574 = vmatpush1.msra.mxu0 %v2329_v12  ;;  %645 = vmatpush1.msra.mxu1 %v2331_v13 }
  0x56   :  { %575 = vmatprep.subr.mxu0 %v2340_v15  ;;  %646 = vmatprep.subr.mxu1 %v2342_v16 }
  0x57   :  { %576 = vmatpush1.msra.mxu0 %v2346_v17  ;;  %647 = vmatpush1.msra.mxu1 %v2348_v18 }
  0x58   :  { %577 = vmatprep.subr.mxu0 %v2352_v19  ;;  %648 = vmatprep.subr.mxu1 %v2354_v20 }
  0x59   :  { %578 = vmatpush1.msra.mxu0 %v2360_v21  ;;  %649 = vmatpush1.msra.mxu1 %v2362_v22 }
  0x5a   :  { %579 = vmatprep.subr.mxu0 %v2371_v24  ;;  %650 = vmatprep.subr.mxu1 %v2373_v25 }
  0x5b   :  { %580 = vmatpush1.msra.mxu0 %v2377_v26  ;;  %651 = vmatpush1.msra.mxu1 %v2379_v27 }
  0x5c   :  { %581 = vmatprep.subr.mxu0 %v2383_v28  ;;  %652 = vmatprep.subr.mxu1 %v2385_v29 }
  0x5d   :  { %582 = vmatpush1.msra.mxu0 %v2391_v30  ;;  %653 = vmatpush1.msra.mxu1 %v2393_v31 }
  0x5e   :  { %583 = vmatprep.subr.mxu0 %v2402_v33  ;;  %654 = vmatprep.subr.mxu1 %v2404_v34 }
  0x5f   :  { %584 = vmatpush1.msra.mxu0 %v2408_v35  ;;  %655 = vmatpush1.msra.mxu1 %v2410_v36 }
  0x60   :  { %585 = vmatprep.subr.mxu0 %v2414_v37  ;;  %656 = vmatprep.subr.mxu1 %v2416_v38 }
  0x61   :  { %586 = vmatpush1.msra.mxu0 %v2422_v39  ;;  %657 = vmatpush1.msra.mxu1 %v2424_v40 }
  0x62   :  { %587 = vmatprep.subr.mxu0 %v2433_v42  ;;  %658 = vmatprep.subr.mxu1 %v2435_v43 }
  0x63   :  { %588 = vmatpush1.msra.mxu0 %v2439_v44  ;;  %659 = vmatpush1.msra.mxu1 %v2441_v45 }
  0x64   :  { %589 = vmatprep.subr.mxu0 %v2445_v46  ;;  %660 = vmatprep.subr.mxu1 %v2447_v47 }
  0x65   :  { %590 = vmatpush1.msra.mxu0 %v2453_v48  ;;  %661 = vmatpush1.msra.mxu1 %v2455_v49 }
  0x66   :  { %591 = vmatprep.subr.mxu0 %v2464_v51  ;;  %662 = vmatprep.subr.mxu1 %v2466_v52 }
  0x67   :  { %592 = vmatpush1.msra.mxu0 %v2470_v53  ;;  %663 = vmatpush1.msra.mxu1 %v2472_v54 }
  0x68   :  { %593 = vmatprep.subr.mxu0 %v2476_v55  ;;  %664 = vmatprep.subr.mxu1 %v2478_v56  ;;  %v3436_v55 = vld [vmem:[#allocation24_spill] sm:$0xff] }
  0x69   :  { %594 = vmatpush1.msra.mxu0 %v2484_v57  ;;  %665 = vmatpush1.msra.mxu1 %v2486_v58 }
  0x6a   :  { %595 = vmatprep.subr.mxu0 %v2495_v60  ;;  %666 = vmatprep.subr.mxu1 %v2497_v61 }
  0x6b   :  { %596 = vmatpush1.msra.mxu0 %v2501_v62  ;;  %667 = vmatpush1.msra.mxu1 %v2503_v63 }
  0x6c   :  { %597 = vmatprep.subr.mxu0 %v2507_v1  ;;  %668 = vmatprep.subr.mxu1 %v2509_v2 }
  0x6d   :  { %598 = vmatpush1.msra.mxu0 %v2515_v3  ;;  %669 = vmatpush1.msra.mxu1 %v3436_v55 }
  0x6e   :  { %599 = vmatprep.subr.mxu0 %v2526_v14  ;;  %670 = vmatprep.subr.mxu1 %v2528_v23  ;;  %v66_v23 = vlaneseq }
  0x6f   :  { %600 = vmatpush1.msra.mxu0 %v2532_v32  ;;  %671 = vmatpush1.msra.mxu1 %v2534_v41 }
  0x70   :  { %601 = vmatprep.subr.mxu0 %v2538_v50  ;;  %672 = vmatprep.subr.mxu1 %v2540_v59  ;;  %v67_v32 = vshrl.u32 %v66_v23, 7 }
  0x71   :  { %602 = vmatpush1.msra.mxu0 %v2544_v0  ;;  %635 = vmatprep.mubr.f32.mxu0 %v3435_v5  ;;  %v64_v0 = vld [vmem:[%s3321_s3] sm:$0xf] }
  0x72   :  { %673 = vmatpush1.msra.mxu1 %v2548_v4  ;;  %706 = vmatprep.mubr.f32.mxu1 %v3435_v5  ;;  %v68_v50 = vsub.s32 0, %v67_v32  ;;  %v76_v59 = vsub.s32 2, %v67_v32  ;;  %v72_v5 = vsub.s32 1, %v67_v32 }
  0x73   :  { %741 = vmatprep.subr.mxu0 %v2311_v6  ;;  %812 = vmatprep.subr.mxu1 %v2313_v7  ;;  %v80_v6 = vsub.s32 3, %v67_v32 }
  0x74   :  { %v69_v3 = vrot.slane %v64_v0, %v68_v50  ;;  %v2637_v7 = vrot.slane %v64_v0, %v76_v59  ;;  %v73_v1 = vrot.slane %v64_v0, %v72_v5 }
  0x75   :  { %v2639_v63 = vrot.slane %v64_v0, %v80_v6 }
  0xe1   :  { %v2626_v14 = vpop.f32.mrf.mxu0  ;;  %v2628_v41 = vpop.f32.mrf.mxu1 }
  0xe3   :  { %v2633_v55 = vpop.f32.mrf.mxu0  ;;  %v2635_v4 = vpop.f32.mrf.mxu1 }
  0xe7   :  { %v183_v23 = vpop.f32.mrf.mxu0  ;;  %v296_v2 = vpop.f32.mrf.mxu1 }
  0xe8   :  { %v2641_v62 = vadd.f32 %v183_v23, %v69_v3  ;;  %v2644_v61 = vadd.f32 %v296_v2, %v2637_v7 }
  0xe9   :  { %v185_v60 = vpop.f32.mrf.mxu0  ;;  %v298_v58 = vpop.f32.mrf.mxu1 }
  0xea   :  { %3437 = vst [vmem:[#allocation33_spill] sm:$0xff] %v2641_v62  ;;  %3438 = vst [vmem:[#allocation34_spill] sm:$0xff] %v2644_v61  ;;  %v2646_v57 = vadd.f32 %v185_v60, %v73_v1  ;;  %v2649_v56 = vadd.f32 %v298_v58, %v2639_v63 }
  0xec   :  { %3439 = vst [vmem:[#allocation35_spill] sm:$0xff] %v2646_v57  ;;  %3440 = vst [vmem:[#allocation36_spill] sm:$0xff] %v2649_v56 }
  0xed   :  { %v189_v32 = vpop.f32.mrf.mxu0  ;;  %v302_v50 = vpop.f32.mrf.mxu1 }
  0xee   :  { %v2651_v59 = vadd.f32 %v189_v32, %v69_v3  ;;  %v2654_v5 = vadd.f32 %v302_v50, %v2637_v7 }
  0xef   :  { %v191_v0 = vpop.f32.mrf.mxu0  ;;  %v304_v6 = vpop.f32.mrf.mxu1 }
  0xf0   :  { %3441 = vst [vmem:[#allocation37_spill] sm:$0xff] %v2651_v59  ;;  %3442 = vst [vmem:[#allocation38_spill] sm:$0xff] %v2654_v5  ;;  %v2656_v23 = vadd.f32 %v191_v0, %v73_v1  ;;  %v2659_v2 = vadd.f32 %v304_v6, %v2639_v63 }
  0xf2   :  { %3443 = vst [vmem:[#allocation39_spill] sm:$0xff] %v2656_v23  ;;  %3444 = vst [vmem:[#allocation40_spill] sm:$0xff] %v2659_v2 }
  0xf3   :  { %v195_v61 = vpop.f32.mrf.mxu0  ;;  %v308_v60 = vpop.f32.mrf.mxu1 }
  0xf4   :  { %v2661_v57 = vadd.f32 %v195_v61, %v69_v3  ;;  %v2664_v58 = vadd.f32 %v308_v60, %v2637_v7 }
  0xf5   :  { %v197_v56 = vpop.f32.mrf.mxu0  ;;  %v310_v32 = vpop.f32.mrf.mxu1 }
  0xf6   :  { %3445 = vst [vmem:[#allocation41_spill] sm:$0xff] %v2661_v57  ;;  %3446 = vst [vmem:[#allocation42_spill] sm:$0xff] %v2664_v58  ;;  %v2666_v59 = vadd.f32 %v197_v56, %v73_v1  ;;  %v2669_v50 = vadd.f32 %v310_v32, %v2639_v63 }
  0xf8   :  { %3447 = vst [vmem:[#allocation43_spill] sm:$0xff] %v2666_v59  ;;  %3448 = vst [vmem:[#allocation44_spill] sm:$0xff] %v2669_v50 }
  0xf9   :  { %v201_v5 = vpop.f32.mrf.mxu0  ;;  %v314_v0 = vpop.f32.mrf.mxu1 }
  0xfa   :  { %v2671_v23 = vadd.f32 %v201_v5, %v69_v3  ;;  %v2674_v6 = vadd.f32 %v314_v0, %v2637_v7 }
  0xfb   :  { %v203_v2 = vpop.f32.mrf.mxu0  ;;  %v316_v61 = vpop.f32.mrf.mxu1 }
  0xfc   :  { %3449 = vst [vmem:[#allocation45_spill] sm:$0xff] %v2671_v23  ;;  %3450 = vst [vmem:[#allocation46_spill] sm:$0xff] %v2674_v6  ;;  %v2676_v57 = vadd.f32 %v203_v2, %v73_v1  ;;  %v2679_v60 = vadd.f32 %v316_v61, %v2639_v63 }
  0xfe   :  { %3451 = vst [vmem:[#allocation47_spill] sm:$0xff] %v2676_v57  ;;  %3452 = vst [vmem:[#allocation48_spill] sm:$0xff] %v2679_v60 }
  0xff   :  { %v207_v58 = vpop.f32.mrf.mxu0  ;;  %v320_v56 = vpop.f32.mrf.mxu1 }
 0x100   :  { %v2681_v59 = vadd.f32 %v207_v58, %v69_v3  ;;  %v2684_v32 = vadd.f32 %v320_v56, %v2637_v7 }
 0x101   :  { %v209_v50 = vpop.f32.mrf.mxu0  ;;  %v322_v5 = vpop.f32.mrf.mxu1 }
 0x102   :  { %3453 = vst [vmem:[#allocation49_spill] sm:$0xff] %v2681_v59  ;;  %3454 = vst [vmem:[#allocation50_spill] sm:$0xff] %v2684_v32  ;;  %v2686_v23 = vadd.f32 %v209_v50, %v73_v1  ;;  %v2689_v0 = vadd.f32 %v322_v5, %v2639_v63 }
 0x104   :  { %3455 = vst [vmem:[#allocation51_spill] sm:$0xff] %v2686_v23  ;;  %3456 = vst [vmem:[#allocation52_spill] sm:$0xff] %v2689_v0 }
 0x105   :  { %v213_v6 = vpop.f32.mrf.mxu0  ;;  %v326_v2 = vpop.f32.mrf.mxu1 }
 0x106   :  { %v2691_v57 = vadd.f32 %v213_v6, %v69_v3  ;;  %v2694_v61 = vadd.f32 %v326_v2, %v2637_v7 }
 0x107   :  { %v215_v60 = vpop.f32.mrf.mxu0  ;;  %v328_v58 = vpop.f32.mrf.mxu1 }
 0x108   :  { %3457 = vst [vmem:[#allocation53_spill] sm:$0xff] %v2691_v57  ;;  %3458 = vst [vmem:[#allocation54_spill] sm:$0xff] %v2694_v61  ;;  %v2696_v59 = vadd.f32 %v215_v60, %v73_v1  ;;  %v2699_v56 = vadd.f32 %v328_v58, %v2639_v63  ;;  %v178_v60 = vadd.f32 %v2626_v14, %v69_v3 }
 0x109   :  { %v180_v58 = vadd.f32 %v2633_v55, %v73_v1 }
 0x10a   :  { %3459 = vst [vmem:[#allocation55_spill] sm:$0xff] %v2696_v59  ;;  %3460 = vst [vmem:[#allocation56_spill] sm:$0xff] %v2699_v56 }
 0x10b   :  { %v219_v32 = vpop.f32.mrf.mxu0  ;;  %v332_v50 = vpop.f32.mrf.mxu1 }
 0x10c   :  { %v2701_v23 = vadd.f32 %v219_v32, %v69_v3  ;;  %v2704_v5 = vadd.f32 %v332_v50, %v2637_v7 }
 0x10d   :  { %v221_v0 = vpop.f32.mrf.mxu0  ;;  %v334_v6 = vpop.f32.mrf.mxu1 }
 0x10e   :  { %3461 = vst [vmem:[#allocation57_spill] sm:$0xff] %v2701_v23  ;;  %3462 = vst [vmem:[#allocation58_spill] sm:$0xff] %v2704_v5  ;;  %v2706_v57 = vadd.f32 %v221_v0, %v73_v1  ;;  %v2709_v2 = vadd.f32 %v334_v6, %v2639_v63  ;;  %v293_v0 = vadd.f32 %v2635_v4, %v2639_v63 }
 0x10f   :  { %v291_v6 = vadd.f32 %v2628_v41, %v2637_v7 }
 0x110   :  { %3463 = vst [vmem:[#allocation59_spill] sm:$0xff] %v2706_v57  ;;  %3464 = vst [vmem:[#allocation60_spill] sm:$0xff] %v2709_v2 }
 0x111   :  { %v467_v61 = vpop.f32.mrf.mxu0  ;;  %v538_v23 = vpop.f32.mrf.mxu1 }
 0x112   :  { %v543_v56 = vadd.f32 %v467_v61, %v178_v60  ;;  %v545_v2 = vadd.f32 %v538_v23, %v291_v6  ;;  %v3465_v23 = vld [vmem:[#allocation13_spill] sm:$0xff]  ;;  %v3470_v6 = vld [vmem:[#allocation18_spill] sm:$0xff] }
 0x113   :  { %v469_v59 = vpop.f32.mrf.mxu0  ;;  %v540_v5 = vpop.f32.mrf.mxu1 }
 0x114   :  { %v1896_v62 = vmul.f32 -1.442695, %v543_v56  ;;  %v544_v32 = vadd.f32 %v469_v59, %v180_v58  ;;  %v546_v57 = vadd.f32 %v540_v5, %v293_v0  ;;  %v3469_v0 = vld [vmem:[#allocation17_spill] sm:$0xff] }
 0x116   :  { %1982 = vpow2.f32 %v1896_v62  ;;  %v1897_v50 = vmul.f32 -1.442695, %v544_v32  ;;  %v1898_v3 = vmul.f32 -1.442695, %v546_v57  ;;  %v3467_v32 = vld [vmem:[#allocation15_spill] sm:$0xff] }
 0x118   :  { %1984 = vpow2.f32 %v1897_v50  ;;  %v3468_v50 = vld [vmem:[#allocation16_spill] sm:$0xff] }
 0x119   :  { %1986 = vpow2.f32 %v1898_v3  ;;  %v3471_v3 = vld [vmem:[#allocation19_spill] sm:$0xff] }
 0x123   :  { %v1983_v14 = vpop.eup %1982 }
 0x124   :  { %v550_v55 = vadd.f32 1.0, %v1983_v14  ;;  %v3472_v14 = vld [vmem:[#allocation20_spill] sm:$0xff] }
 0x125   :  { %v1985_v1 = vpop.eup %1984 }
 0x126   :  { %1988 = vrcp.f32 %v550_v55  ;;  %v556_v59 = vadd.f32 1.0, %v1985_v1  ;;  %v1987_v62 = vpop.eup %1986  ;;  %v3473_v55 = vld [vmem:[#allocation21_spill] sm:$0xff]  ;;  %v3474_v1 = vld [vmem:[#allocation22_spill] sm:$0xff] }
 0x127   :  { %1990 = vtanh.f32 %v545_v2  ;;  %v563_v58 = vadd.f32 1.0, %v1987_v62  ;;  %v3466_v2 = vld [vmem:[#allocation14_spill] sm:$0xff]  ;;  %v3476_v62 = vld [vmem:[#allocation24_spill] sm:$0xff] }
 0x128   :  { %1992 = vrcp.f32 %v556_v59  ;;  %v3475_v59 = vld [vmem:[#allocation23_spill] sm:$0xff] }
 0x129   :  { %1994 = vrcp.f32 %v563_v58  ;;  %v3480_v58 = vld [vmem:[#allocation28_spill] sm:$0xff] }
 0x133   :  { %v1989_v61 = vpop.eup %1988 }
 0x134   :  { %v1991_v56 = vpop.eup %1990 }
 0x135   :  { %v1993_v60 = vpop.eup %1992  ;;  %v567_v4 = vmul.f32 %v1991_v56, %v1989_v61  ;;  %v3477_v61 = vld [vmem:[#allocation25_spill] sm:$0xff]  ;;  %v3478_v56 = vld [vmem:[#allocation26_spill] sm:$0xff] }
 0x136   :  { %v566_v63 = vmul.f32 0.0, %v1993_v60  ;;  %v1995_v7 = vpop.eup %1994  ;;  %v3479_v60 = vld [vmem:[#allocation27_spill] sm:$0xff] }
 0x138   :  { %v2717_v5 = vadd.f32 %v567_v4, %v566_v63  ;;  %v3481_v63 = vld [vmem:[#allocation29_spill] sm:$0xff]  ;;  %v3482_v4 = vld [vmem:[#allocation30_spill] sm:$0xff] }
 0x13a   :  { %1996 = vtanh.f32 %v2717_v5 }
 0x147   :  { %v1997_v57 = vpop.eup %1996 }
 0x148   :  { %v570_v41 = vmul.f32 %v1997_v57, %v1995_v7  ;;  %v3483_v7 = vld [vmem:[#allocation31_spill] sm:$0xff]  ;;  %v3484_v57 = vmov 0.0  }
 0x14a   :  { %636 = vmatmul.mubr.f32.vlgmr.msra.gmra.mxu0 %v570_v41  ;;  %707 = vmatmul.mubr.f32.vlgmr.msra.gmra.mxu1 %v570_v41  ;;  %v3485_v41 = vld [vmem:[#allocation32_spill] sm:$0xff] }
 0x14b   :  { %742 = vmatpush1.msra.mxu0 %v2315_v8  ;;  %813 = vmatpush1.msra.mxu1 %v2317_v9 }
 0x14c   :  { %743 = vmatprep.subr.mxu0 %v2321_v10  ;;  %814 = vmatprep.subr.mxu1 %v2323_v11 }
 0x14d   :  { %744 = vmatpush1.msra.mxu0 %v2329_v12  ;;  %815 = vmatpush1.msra.mxu1 %v2331_v13 }
 0x14e   :  { %745 = vmatprep.subr.mxu0 %v2340_v15  ;;  %816 = vmatprep.subr.mxu1 %v2342_v16 }
 0x14f   :  { %746 = vmatpush1.msra.mxu0 %v2346_v17  ;;  %817 = vmatpush1.msra.mxu1 %v2348_v18 }
 0x150   :  { %747 = vmatprep.subr.mxu0 %v2352_v19  ;;  %818 = vmatprep.subr.mxu1 %v2354_v20 }
 0x151   :  { %748 = vmatpush1.msra.mxu0 %v2360_v21  ;;  %819 = vmatpush1.msra.mxu1 %v2362_v22 }
 0x152   :  { %749 = vmatprep.subr.mxu0 %v2371_v24  ;;  %820 = vmatprep.subr.mxu1 %v2373_v25 }
 0x153   :  { %750 = vmatpush1.msra.mxu0 %v2377_v26  ;;  %821 = vmatpush1.msra.mxu1 %v2379_v27 }
 0x154   :  { %751 = vmatprep.subr.mxu0 %v2383_v28  ;;  %822 = vmatprep.subr.mxu1 %v2385_v29 }
 0x155   :  { %752 = vmatpush1.msra.mxu0 %v2391_v30  ;;  %823 = vmatpush1.msra.mxu1 %v2393_v31 }
 0x156   :  { %753 = vmatprep.subr.mxu0 %v2402_v33  ;;  %824 = vmatprep.subr.mxu1 %v2404_v34 }
 0x157   :  { %754 = vmatpush1.msra.mxu0 %v2408_v35  ;;  %825 = vmatpush1.msra.mxu1 %v2410_v36 }
 0x158   :  { %755 = vmatprep.subr.mxu0 %v2414_v37  ;;  %826 = vmatprep.subr.mxu1 %v2416_v38 }
 0x159   :  { %756 = vmatpush1.msra.mxu0 %v2422_v39  ;;  %827 = vmatpush1.msra.mxu1 %v2424_v40 }
 0x15a   :  { %757 = vmatprep.subr.mxu0 %v2433_v42  ;;  %828 = vmatprep.subr.mxu1 %v2435_v43 }
 0x15b   :  { %758 = vmatpush1.msra.mxu0 %v2439_v44  ;;  %829 = vmatpush1.msra.mxu1 %v2441_v45 }
 0x15c   :  { %759 = vmatprep.subr.mxu0 %v2445_v46  ;;  %830 = vmatprep.subr.mxu1 %v2447_v47 }
 0x15d   :  { %760 = vmatpush1.msra.mxu0 %v2453_v48  ;;  %831 = vmatpush1.msra.mxu1 %v2455_v49 }
 0x15e   :  { %761 = vmatprep.subr.mxu0 %v2464_v51  ;;  %832 = vmatprep.subr.mxu1 %v2466_v52 }
 0x15f   :  { %762 = vmatpush1.msra.mxu0 %v2470_v53  ;;  %833 = vmatpush1.msra.mxu1 %v2472_v54 }
 0x160   :  { %763 = vmatprep.subr.mxu0 %v3465_v23  ;;  %834 = vmatprep.subr.mxu1 %v3466_v2 }
 0x161   :  { %764 = vmatpush1.msra.mxu0 %v3467_v32  ;;  %835 = vmatpush1.msra.mxu1 %v3468_v50 }
 0x162   :  { %765 = vmatprep.subr.mxu0 %v3469_v0  ;;  %836 = vmatprep.subr.mxu1 %v3470_v6  ;;  %v3491_v6 = vld [vmem:[#allocation34_spill] sm:$0xff] }
 0x163   :  { %766 = vmatpush1.msra.mxu0 %v3471_v3  ;;  %837 = vmatpush1.msra.mxu1 %v3472_v14  ;;  %v3490_v3 = vld [vmem:[#allocation36_spill] sm:$0xff] }
 0x164   :  { %767 = vmatprep.subr.mxu0 %v3473_v55  ;;  %838 = vmatprep.subr.mxu1 %v3474_v1 }
 0x165   :  { %768 = vmatpush1.msra.mxu0 %v3475_v59  ;;  %839 = vmatpush1.msra.mxu1 %v3476_v62  ;;  %v3486_v62 = vld [vmem:[#allocation11_spill] sm:$0xff] }
 0x166   :  { %769 = vmatprep.subr.mxu0 %v3477_v61  ;;  %840 = vmatprep.subr.mxu1 %v3478_v56  ;;  %v3487_v61 = vld [vmem:[#allocation12_spill] sm:$0xff] }
 0x167   :  { %770 = vmatpush1.msra.mxu0 %v3479_v60  ;;  %841 = vmatpush1.msra.mxu1 %v3480_v58  ;;  %v3488_v60 = vld [vmem:[#allocation33_spill] sm:$0xff] }
 0x168   :  { %771 = vmatprep.subr.mxu0 %v3481_v63  ;;  %842 = vmatprep.subr.mxu1 %v3482_v4  ;;  %v3489_v63 = vld [vmem:[#allocation35_spill] sm:$0xff] }
 0x169   :  { %772 = vmatpush1.msra.mxu0 %v3483_v7  ;;  %805 = vmatprep.mubr.f32.mxu0 %v3484_v57 }
 0x16a   :  { %843 = vmatpush1.msra.mxu1 %v3485_v41  ;;  %876 = vmatprep.mubr.f32.mxu1 %v3484_v57 }
 0x16b   :  { %911 = vmatprep.subr.mxu0 %v3486_v62  ;;  %982 = vmatprep.subr.mxu1 %v3487_v61 }
 0x20a   :  { %v637_v56 = vpop.f32.mrf.mxu0  ;;  %v708_v4 = vpop.f32.mrf.mxu1 }
 0x20b   :  { %v713_v59 = vadd.f32 %v637_v56, %v3488_v60  ;;  %v715_v57 = vadd.f32 %v708_v4, %v3491_v6 }
 0x20c   :  { %v639_v58 = vpop.f32.mrf.mxu0  ;;  %v710_v14 = vpop.f32.mrf.mxu1 }
 0x20d   :  { %v1899_v1 = vmul.f32 -1.442695, %v713_v59  ;;  %v714_v55 = vadd.f32 %v639_v58, %v3489_v63  ;;  %v716_v41 = vadd.f32 %v710_v14, %v3490_v3 }
 0x20f   :  { %1998 = vpow2.f32 %v1899_v1  ;;  %v1900_v7 = vmul.f32 -1.442695, %v714_v55  ;;  %v1901_v0 = vmul.f32 -1.442695, %v716_v41 }
 0x211   :  { %2000 = vpow2.f32 %v1900_v7 }
 0x212   :  { %2002 = vtanh.f32 %v715_v57 }
 0x213   :  { %2004 = vpow2.f32 %v1901_v0 }
 0x21c   :  { %v1999_v62 = vpop.eup %1998 }
 0x21d   :  { %v720_v50 = vadd.f32 1.0, %v1999_v62 }
 0x21e   :  { %v2001_v61 = vpop.eup %2000 }
 0x21f   :  { %2006 = vrcp.f32 %v720_v50  ;;  %v726_v56 = vadd.f32 1.0, %v2001_v61  ;;  %v2003_v59 = vpop.eup %2002  ;;  %v3513_v50 = vld [vmem:[#allocation39_spill] sm:$0xff]  ;;  %v3514_v61 = vld [vmem:[#allocation40_spill] sm:$0xff] }
 0x220   :  { %v2005_v60 = vpop.eup %2004 }
 0x221   :  { %2008 = vrcp.f32 %v726_v56  ;;  %v733_v63 = vadd.f32 1.0, %v2005_v60 }
 0x223   :  { %2010 = vrcp.f32 %v733_v63 }
 0x22c   :  { %v2007_v1 = vpop.eup %2006 }
 0x22d   :  { %v737_v58 = vmul.f32 %v2007_v1, %v2003_v59  ;;  %v3515_v59 = vld [vmem:[#allocation38_spill] sm:$0xff] }
 0x22e   :  { %v2009_v55 = vpop.eup %2008 }
 0x22f   :  { %v736_v7 = vmul.f32 %v2009_v55, %v2717_v5 }
 0x230   :  { %v2011_v6 = vpop.eup %2010 }
 0x231   :  { %v2791_v3 = vadd.f32 %v737_v58, %v736_v7 }
 0x233   :  { %2012 = vtanh.f32 %v2791_v3 }
 0x240   :  { %v2013_v14 = vpop.eup %2012 }
 0x241   :  { %v740_v4 = vmul.f32 %v2013_v14, %v2011_v6 }
 0x243   :  { %806 = vmatmul.mubr.f32.vlgmr.msra.gmra.mxu0 %v740_v4  ;;  %877 = vmatmul.mubr.f32.vlgmr.msra.gmra.mxu1 %v740_v4 }
 0x244   :  { %912 = vmatpush1.msra.mxu0 %v2315_v8  ;;  %983 = vmatpush1.msra.mxu1 %v2317_v9  ;;  %v3492_v8 = vld [vmem:[#allocation16_spill] sm:$0xff]  ;;  %v3493_v9 = vld [vmem:[#allocation17_spill] sm:$0xff] }
 0x245   :  { %913 = vmatprep.subr.mxu0 %v2321_v10  ;;  %984 = vmatprep.subr.mxu1 %v2323_v11  ;;  %v3494_v10 = vld [vmem:[#allocation18_spill] sm:$0xff]  ;;  %v3495_v11 = vld [vmem:[#allocation19_spill] sm:$0xff] }
 0x246   :  { %914 = vmatpush1.msra.mxu0 %v2329_v12  ;;  %985 = vmatpush1.msra.mxu1 %v2331_v13  ;;  %v3496_v12 = vld [vmem:[#allocation20_spill] sm:$0xff]  ;;  %v3497_v13 = vld [vmem:[#allocation21_spill] sm:$0xff] }
 0x247   :  { %915 = vmatprep.subr.mxu0 %v2340_v15  ;;  %986 = vmatprep.subr.mxu1 %v2342_v16  ;;  %v3498_v15 = vld [vmem:[#allocation22_spill] sm:$0xff]  ;;  %v3499_v16 = vld [vmem:[#allocation23_spill] sm:$0xff] }
 0x248   :  { %916 = vmatpush1.msra.mxu0 %v2346_v17  ;;  %987 = vmatpush1.msra.mxu1 %v2348_v18  ;;  %v3500_v17 = vld [vmem:[#allocation24_spill] sm:$0xff]  ;;  %v3501_v18 = vld [vmem:[#allocation25_spill] sm:$0xff] }
 0x249   :  { %917 = vmatprep.subr.mxu0 %v2352_v19  ;;  %988 = vmatprep.subr.mxu1 %v2354_v20  ;;  %v3502_v19 = vld [vmem:[#allocation26_spill] sm:$0xff]  ;;  %v3503_v20 = vld [vmem:[#allocation27_spill] sm:$0xff] }
 0x24a   :  { %918 = vmatpush1.msra.mxu0 %v2360_v21  ;;  %989 = vmatpush1.msra.mxu1 %v2362_v22  ;;  %v3504_v21 = vld [vmem:[#allocation28_spill] sm:$0xff]  ;;  %v3505_v22 = vld [vmem:[#allocation29_spill] sm:$0xff] }
 0x24b   :  { %919 = vmatprep.subr.mxu0 %v2371_v24  ;;  %990 = vmatprep.subr.mxu1 %v2373_v25  ;;  %v3506_v24 = vld [vmem:[#allocation30_spill] sm:$0xff]  ;;  %v3507_v25 = vld [vmem:[#allocation31_spill] sm:$0xff] }
 0x24c   :  { %920 = vmatpush1.msra.mxu0 %v2377_v26  ;;  %991 = vmatpush1.msra.mxu1 %v2379_v27  ;;  %v3508_v26 = vmov 0.0   ;;  %v3509_v27 = vld [vmem:[#allocation32_spill] sm:$0xff] }
 0x24d   :  { %921 = vmatprep.subr.mxu0 %v2383_v28  ;;  %992 = vmatprep.subr.mxu1 %v2385_v29  ;;  %v2858_v28 = vld [vmem:[#allocation2 + $0x1e8] sm:$0xff]  ;;  %v2861_v29 = vld [vmem:[#allocation2 + $0x1f8] sm:$0xff] }
 0x24e   :  { %922 = vmatpush1.msra.mxu0 %v2391_v30  ;;  %993 = vmatpush1.msra.mxu1 %v2393_v31  ;;  %3510 = vst [vmem:[#allocation13_spill] sm:$0xff] %v2858_v28  ;;  %3511 = vst [vmem:[#allocation14_spill] sm:$0xff] %v2861_v29  ;;  %v3512_v31 = vld [vmem:[#allocation37_spill] sm:$0xff] }
 0x24f   :  { %923 = vmatprep.subr.mxu0 %v2402_v33  ;;  %994 = vmatprep.subr.mxu1 %v2404_v34 }
 0x250   :  { %924 = vmatpush1.msra.mxu0 %v2408_v35  ;;  %995 = vmatpush1.msra.mxu1 %v2410_v36 }
 0x251   :  { %925 = vmatprep.subr.mxu0 %v2414_v37  ;;  %996 = vmatprep.subr.mxu1 %v2416_v38 }
 0x252   :  { %926 = vmatpush1.msra.mxu0 %v2422_v39  ;;  %997 = vmatpush1.msra.mxu1 %v2424_v40 }
 0x253   :  { %927 = vmatprep.subr.mxu0 %v2433_v42  ;;  %998 = vmatprep.subr.mxu1 %v2435_v43 }
 0x254   :  { %928 = vmatpush1.msra.mxu0 %v2439_v44  ;;  %999 = vmatpush1.msra.mxu1 %v2441_v45 }
 0x255   :  { %929 = vmatprep.subr.mxu0 %v2445_v46  ;;  %1000 = vmatprep.subr.mxu1 %v2447_v47 }
 0x256   :  { %930 = vmatpush1.msra.mxu0 %v2453_v48  ;;  %1001 = vmatpush1.msra.mxu1 %v2455_v49 }
 0x257   :  { %931 = vmatprep.subr.mxu0 %v2464_v51  ;;  %1002 = vmatprep.subr.mxu1 %v2466_v52 }
 0x258   :  { %932 = vmatpush1.msra.mxu0 %v2470_v53  ;;  %1003 = vmatpush1.msra.mxu1 %v2472_v54 }
 0x259   :  { %933 = vmatprep.subr.mxu0 %v3465_v23  ;;  %1004 = vmatprep.subr.mxu1 %v3466_v2 }
 0x25a   :  { %934 = vmatpush1.msra.mxu0 %v3467_v32  ;;  %1005 = vmatpush1.msra.mxu1 %v3492_v8 }
 0x25b   :  { %935 = vmatprep.subr.mxu0 %v3493_v9  ;;  %1006 = vmatprep.subr.mxu1 %v3494_v10 }
 0x25c   :  { %936 = vmatpush1.msra.mxu0 %v3495_v11  ;;  %1007 = vmatpush1.msra.mxu1 %v3496_v12 }
 0x25d   :  { %937 = vmatprep.subr.mxu0 %v3497_v13  ;;  %1008 = vmatprep.subr.mxu1 %v3498_v15 }
 0x25e   :  { %938 = vmatpush1.msra.mxu0 %v3499_v16  ;;  %1009 = vmatpush1.msra.mxu1 %v3500_v17 }
 0x25f   :  { %939 = vmatprep.subr.mxu0 %v3501_v18  ;;  %1010 = vmatprep.subr.mxu1 %v3502_v19 }
 0x260   :  { %940 = vmatpush1.msra.mxu0 %v3503_v20  ;;  %1011 = vmatpush1.msra.mxu1 %v3504_v21 }
 0x261   :  { %941 = vmatprep.subr.mxu0 %v3505_v22  ;;  %1012 = vmatprep.subr.mxu1 %v3506_v24 }
 0x262   :  { %942 = vmatpush1.msra.mxu0 %v3507_v25  ;;  %975 = vmatprep.mubr.f32.mxu0 %v3508_v26 }
 0x263   :  { %1013 = vmatpush1.msra.mxu1 %v3509_v27  ;;  %1046 = vmatprep.mubr.f32.mxu1 %v3508_v26 }
 0x264   :  { %1081 = vmatprep.subr.mxu0 %v2858_v28  ;;  %1152 = vmatprep.subr.mxu1 %v2861_v29 }
 0x303   :  { %v807_v30 = vpop.f32.mrf.mxu0  ;;  %v878_v57 = vpop.f32.mrf.mxu1 }
 0x304   :  { %v883_v33 = vadd.f32 %v807_v30, %v3512_v31  ;;  %v885_v60 = vadd.f32 %v878_v57, %v3515_v59  ;;  %v2887_v59 = vld [vmem:[#allocation2 + $0x1d0] sm:$0xff] }
 0x305   :  { %v809_v34 = vpop.f32.mrf.mxu0  ;;  %v880_v62 = vpop.f32.mrf.mxu1 }
 0x306   :  { %v1902_v5 = vmul.f32 -1.442695, %v883_v33  ;;  %v884_v0 = vadd.f32 %v809_v34, %v3513_v50  ;;  %v886_v56 = vadd.f32 %v880_v62, %v3514_v61  ;;  %v2875_v62 = vld [vmem:[#allocation2 + $0x1f0] sm:$0xff]  ;;  %v2878_v61 = vld [vmem:[#allocation2 + $0x1c8] sm:$0xff] }
 0x308   :  { %2014 = vpow2.f32 %v1902_v5  ;;  %v1903_v41 = vmul.f32 -1.442695, %v884_v0  ;;  %v1904_v1 = vmul.f32 -1.442695, %v886_v56  ;;  %v2884_v56 = vld [vmem:[#allocation2 + $0x1c0] sm:$0xff] }
 0x30a   :  { %2016 = vpow2.f32 %v1903_v41  ;;  %v2872_v41 = vld [vmem:[#allocation2 + $0x1e0] sm:$0xff] }
 0x30b   :  { %2018 = vtanh.f32 %v885_v60  ;;  %v2890_v60 = vld [vmem:[#allocation2 + $0x1a8] sm:$0xff] }
 0x30c   :  { %2020 = vpow2.f32 %v1904_v1  ;;  %v2893_v1 = vld [vmem:[#allocation2 + $0x1b8] sm:$0xff] }
 0x315   :  { %v2015_v58 = vpop.eup %2014 }
 0x316   :  { %v890_v55 = vadd.f32 1.0, %v2015_v58  ;;  %v2896_v58 = vld [vmem:[#allocation2 + $0x1a0] sm:$0xff] }
 0x317   :  { %v2017_v63 = vpop.eup %2016 }
 0x318   :  { %2022 = vrcp.f32 %v890_v55  ;;  %v896_v7 = vadd.f32 1.0, %v2017_v63  ;;  %v2019_v6 = vpop.eup %2018  ;;  %v2899_v55 = vld [vmem:[#allocation2 + $0x1b0] sm:$0xff]  ;;  %v2902_v63 = vld [vmem:[#allocation2 + $0x188] sm:$0xff] }
 0x319   :  { %v2021_v14 = vpop.eup %2020 }
 0x31a   :  { %2024 = vrcp.f32 %v896_v7  ;;  %v903_v33 = vadd.f32 1.0, %v2021_v14  ;;  %v2905_v7 = vld [vmem:[#allocation2 + $0x198] sm:$0xff]  ;;  %v2911_v14 = vld [vmem:[#allocation2 + $0x190] sm:$0xff] }
 0x31c   :  { %2026 = vrcp.f32 %v903_v33  ;;  %v2923_v33 = vld [vmem:[#allocation2 + $0x170] sm:$0xff] }
 0x31d   :  { %3517 = vst [vmem:[#allocation11_spill] sm:$0xff] %v2923_v33 }
 0x325   :  { %v2023_v4 = vpop.eup %2022 }
 0x326   :  { %v907_v30 = vmul.f32 %v2023_v4, %v2019_v6  ;;  %v2908_v6 = vld [vmem:[#allocation2 + $0x180] sm:$0xff]  ;;  %v2914_v4 = vld [vmem:[#allocation2 + $0x168] sm:$0xff] }
 0x327   :  { %v2025_v31 = vpop.eup %2024 }
 0x328   :  { %v906_v34 = vmul.f32 %v2025_v31, %v2791_v3  ;;  %v2881_v3 = vld [vmem:[#allocation2 + $0x1d8] sm:$0xff]  ;;  %v2920_v31 = vld [vmem:[#allocation2 + $0x160] sm:$0xff] }
 0x329   :  { %v2027_v50 = vpop.eup %2026  ;;  %3516 = vst [vmem:[#allocation15_spill] sm:$0xff] %v2920_v31 }
 0x32a   :  { %v2869_v5 = vadd.f32 %v907_v30, %v906_v34  ;;  %v2917_v30 = vld [vmem:[#allocation2 + $0x178] sm:$0xff]  ;;  %v2926_v34 = vld [vmem:[#allocation2 + $0x148] sm:$0xff] }
 0x32c   :  { %2028 = vtanh.f32 %v2869_v5 }
 0x339   :  { %v2029_v0 = vpop.eup %2028 }
 0x33a   :  { %v910_v57 = vmul.f32 %v2029_v0, %v2027_v50  ;;  %v2929_v50 = vld [vmem:[#allocation2 + $0x158] sm:$0xff]  ;;  %v2932_v0 = vld [vmem:[#allocation2 + $0x140] sm:$0xff] }
 0x33c   :  { %976 = vmatmul.mubr.f32.vlgmr.msra.gmra.mxu0 %v910_v57  ;;  %1047 = vmatmul.mubr.f32.vlgmr.msra.gmra.mxu1 %v910_v57  ;;  %v2935_v57 = vld [vmem:[#allocation2 + $0x150] sm:$0xff] }
 0x33d   :  { %1082 = vmatpush1.msra.mxu0 %v2872_v41  ;;  %1153 = vmatpush1.msra.mxu1 %v2875_v62 }
 0x33e   :  { %1083 = vmatprep.subr.mxu0 %v2878_v61  ;;  %1154 = vmatprep.subr.mxu1 %v2881_v3 }
 0x33f   :  { %1084 = vmatpush1.msra.mxu0 %v2884_v56  ;;  %1155 = vmatpush1.msra.mxu1 %v2887_v59 }
 0x340   :  { %1085 = vmatprep.subr.mxu0 %v2890_v60  ;;  %1156 = vmatprep.subr.mxu1 %v2893_v1 }
 0x341   :  { %1086 = vmatpush1.msra.mxu0 %v2896_v58  ;;  %1157 = vmatpush1.msra.mxu1 %v2899_v55 }
 0x342   :  { %1087 = vmatprep.subr.mxu0 %v2902_v63  ;;  %1158 = vmatprep.subr.mxu1 %v2905_v7 }
 0x343   :  { %1088 = vmatpush1.msra.mxu0 %v2908_v6  ;;  %1159 = vmatpush1.msra.mxu1 %v2911_v14 }
 0x344   :  { %1089 = vmatprep.subr.mxu0 %v2914_v4  ;;  %1160 = vmatprep.subr.mxu1 %v2917_v30 }
 0x345   :  { %1090 = vmatpush1.msra.mxu0 %v2920_v31  ;;  %1161 = vmatpush1.msra.mxu1 %v2923_v33  ;;  %v2938_v31 = vld [vmem:[#allocation2 + $0x128] sm:$0xff]  ;;  %v2941_v33 = vld [vmem:[#allocation2 + $0x138] sm:$0xff] }
 0x346   :  { %1091 = vmatprep.subr.mxu0 %v2926_v34  ;;  %1162 = vmatprep.subr.mxu1 %v2929_v50 }
 0x347   :  { %1092 = vmatpush1.msra.mxu0 %v2932_v0  ;;  %1163 = vmatpush1.msra.mxu1 %v2935_v57 }
 0x348   :  { %1093 = vmatprep.subr.mxu0 %v2938_v31  ;;  %1164 = vmatprep.subr.mxu1 %v2941_v33 }
 0x349   :  { %1094 = vmatpush1.msra.mxu0 %v2408_v35  ;;  %1165 = vmatpush1.msra.mxu1 %v2410_v36  ;;  %v3518_v36 = vld [vmem:[#allocation41_spill] sm:$0xff] }
 0x34a   :  { %1095 = vmatprep.subr.mxu0 %v2414_v37  ;;  %1166 = vmatprep.subr.mxu1 %v2416_v38 }
 0x34b   :  { %1096 = vmatpush1.msra.mxu0 %v2422_v39  ;;  %1167 = vmatpush1.msra.mxu1 %v2424_v40  ;;  %v3519_v40 = vld [vmem:[#allocation43_spill] sm:$0xff] }
 0x34c   :  { %1097 = vmatprep.subr.mxu0 %v2433_v42  ;;  %1168 = vmatprep.subr.mxu1 %v2435_v43 }
 0x34d   :  { %1098 = vmatpush1.msra.mxu0 %v2439_v44  ;;  %1169 = vmatpush1.msra.mxu1 %v2441_v45 }
 0x34e   :  { %1099 = vmatprep.subr.mxu0 %v2445_v46  ;;  %1170 = vmatprep.subr.mxu1 %v2447_v47  ;;  %v3520_v46 = vld [vmem:[#allocation44_spill] sm:$0xff] }
 0x34f   :  { %1100 = vmatpush1.msra.mxu0 %v2453_v48  ;;  %1171 = vmatpush1.msra.mxu1 %v2455_v49  ;;  %v3521_v48 = vld [vmem:[#allocation42_spill] sm:$0xff] }
 0x350   :  { %1101 = vmatprep.subr.mxu0 %v2464_v51  ;;  %1172 = vmatprep.subr.mxu1 %v2466_v52 }
 0x351   :  { %1102 = vmatpush1.msra.mxu0 %v2470_v53  ;;  %1173 = vmatpush1.msra.mxu1 %v2472_v54 }
 0x352   :  { %1103 = vmatprep.subr.mxu0 %v3465_v23  ;;  %1174 = vmatprep.subr.mxu1 %v3466_v2 }
 0x353   :  { %1104 = vmatpush1.msra.mxu0 %v3467_v32  ;;  %1175 = vmatpush1.msra.mxu1 %v3492_v8 }
 0x354   :  { %1105 = vmatprep.subr.mxu0 %v3493_v9  ;;  %1176 = vmatprep.subr.mxu1 %v3494_v10 }
 0x355   :  { %1106 = vmatpush1.msra.mxu0 %v3495_v11  ;;  %1177 = vmatpush1.msra.mxu1 %v3496_v12 }
 0x356   :  { %1107 = vmatprep.subr.mxu0 %v3497_v13  ;;  %1178 = vmatprep.subr.mxu1 %v3498_v15 }
 0x357   :  { %1108 = vmatpush1.msra.mxu0 %v3499_v16  ;;  %1179 = vmatpush1.msra.mxu1 %v3500_v17 }
 0x358   :  { %1109 = vmatprep.subr.mxu0 %v3501_v18  ;;  %1180 = vmatprep.subr.mxu1 %v3502_v19  ;;  %v3522_v18 = vld [vmem:[#allocation15_spill] sm:$0xff] }
 0x359   :  { %1110 = vmatpush1.msra.mxu0 %v3503_v20  ;;  %1181 = vmatpush1.msra.mxu1 %v3504_v21  ;;  %v3523_v19 = vld [vmem:[#allocation11_spill] sm:$0xff]  ;;  %v3018_v20 = vld [vmem:[#allocation2 + $0x120] sm:$0xff]  ;;  %v3021_v21 = vld [vmem:[#allocation2 + $0x130] sm:$0xff] }
 0x35a   :  { %1111 = vmatprep.subr.mxu0 %v3505_v22  ;;  %1182 = vmatprep.subr.mxu1 %v3506_v24  ;;  %v3024_v22 = vld [vmem:[#allocation2 + $0x108] sm:$0xff]  ;;  %v3027_v24 = vld [vmem:[#allocation2 + $0x118] sm:$0xff] }
 0x35b   :  { %1112 = vmatpush1.msra.mxu0 %v3507_v25  ;;  %1145 = vmatprep.mubr.f32.mxu0 %v3508_v26  ;;  %v3030_v25 = vld [vmem:[#allocation2 + $0x100] sm:$0xff] }
 0x35c   :  { %1183 = vmatpush1.msra.mxu1 %v3509_v27  ;;  %1216 = vmatprep.mubr.f32.mxu1 %v3508_v26  ;;  %v3033_v27 = vld [vmem:[#allocation2 + $0x110] sm:$0xff] }
 0x35d   :  { %1251 = vmatprep.subr.mxu0 %v2858_v28  ;;  %1322 = vmatprep.subr.mxu1 %v2861_v29 }
 0x3fc   :  { %v977_v35 = vpop.f32.mrf.mxu0  ;;  %v1048_v43 = vpop.f32.mrf.mxu1 }
 0x3fd   :  { %v1053_v37 = vadd.f32 %v977_v35, %v3518_v36  ;;  %v1055_v49 = vadd.f32 %v1048_v43, %v3521_v48  ;;  %v3039_v35 = vld [vmem:[#allocation2 + $0xf8] sm:$0xff]  ;;  %v3042_v36 = vld [vmem:[#allocation2 + $0xe0] sm:$0xff]  ;;  %v3060_v43 = vld [vmem:[#allocation2 + $0xa8] sm:$0xff] }
 0x3fe   :  { %v979_v38 = vpop.f32.mrf.mxu0  ;;  %v1050_v45 = vpop.f32.mrf.mxu1  ;;  %v3075_v48 = vld [vmem:[#allocation2 + $0x98] sm:$0xff] }
 0x3ff   :  { %v1905_v39 = vmul.f32 -1.442695, %v1053_v37  ;;  %v1054_v42 = vadd.f32 %v979_v38, %v3519_v40  ;;  %v1056_v47 = vadd.f32 %v1050_v45, %v3520_v46  ;;  %v3045_v37 = vld [vmem:[#allocation2 + $0xf0] sm:$0xff]  ;;  %v3048_v38 = vld [vmem:[#allocation2 + $0xc8] sm:$0xff]  ;;  %v3054_v40 = vld [vmem:[#allocation2 + $0xc0] sm:$0xff] }
 0x400   :  { %v3066_v45 = vld [vmem:[#allocation2 + $0xa0] sm:$0xff]  ;;  %v3069_v46 = vld [vmem:[#allocation2 + $0xb0] sm:$0xff] }
 0x401   :  { %2030 = vpow2.f32 %v1905_v39  ;;  %v1906_v44 = vmul.f32 -1.442695, %v1054_v42  ;;  %v1907_v51 = vmul.f32 -1.442695, %v1056_v47  ;;  %v3051_v39 = vld [vmem:[#allocation2 + $0xd8] sm:$0xff]  ;;  %v3057_v42 = vld [vmem:[#allocation2 + $0xd0] sm:$0xff] }
 0x402   :  { %v3072_v47 = vld [vmem:[#allocation2 + $0x88] sm:$0xff] }
 0x403   :  { %2032 = vpow2.f32 %v1906_v44  ;;  %v3063_v44 = vld [vmem:[#allocation2 + $0xb8] sm:$0xff] }
 0x404   :  { %2034 = vtanh.f32 %v1055_v49  ;;  %v3078_v49 = vld [vmem:[#allocation2 + $0x80] sm:$0xff] }
 0x405   :  { %2036 = vpow2.f32 %v1907_v51  ;;  %v3081_v51 = vld [vmem:[#allocation2 + $0x90] sm:$0xff] }
 0x406   :  { %3524 = vst [vmem:[#allocation12_spill] sm:$0xff] %v3081_v51 }
 0x40e   :  { %v2031_v52 = vpop.eup %2030 }
 0x40f   :  { %v1060_v53 = vadd.f32 1.0, %v2031_v52  ;;  %v3084_v52 = vld [vmem:[#allocation2 + $0x68] sm:$0xff] }
 0x410   :  { %v2033_v54 = vpop.eup %2032  ;;  %3525 = vst [vmem:[#allocation33_spill] sm:$0xff] %v3084_v52 }
 0x411   :  { %2038 = vrcp.f32 %v1060_v53  ;;  %v1066_v23 = vadd.f32 1.0, %v2033_v54  ;;  %v2035_v2 = vpop.eup %2034  ;;  %v3087_v53 = vld [vmem:[#allocation2 + $0x78] sm:$0xff]  ;;  %v3090_v54 = vld [vmem:[#allocation2 + $0x60] sm:$0xff] }
 0x412   :  { %v2037_v32 = vpop.eup %2036  ;;  %3526 = vst [vmem:[#allocation35_spill] sm:$0xff] %v3087_v53  ;;  %3527 = vst [vmem:[#allocation36_spill] sm:$0xff] %v3090_v54 }
 0x413   :  { %2040 = vrcp.f32 %v1066_v23  ;;  %v1073_v11 = vadd.f32 1.0, %v2037_v32  ;;  %v3093_v23 = vld [vmem:[#allocation2 + $0x70] sm:$0xff]  ;;  %v3099_v32 = vld [vmem:[#allocation2 + $0x58] sm:$0xff] }
 0x414   :  { %3528 = vst [vmem:[#allocation34_spill] sm:$0xff] %v3093_v23  ;;  %3530 = vst [vmem:[#allocation17_spill] sm:$0xff] %v3099_v32 }
 0x415   :  { %2042 = vrcp.f32 %v1073_v11  ;;  %v3111_v11 = vld [vmem:[#allocation2 + $0x38] sm:$0xff] }
 0x416   :  { %3534 = vst [vmem:[#allocation21_spill] sm:$0xff] %v3111_v11 }
 0x41e   :  { %v2039_v8 = vpop.eup %2038 }
 0x41f   :  { %v1077_v9 = vmul.f32 %v2039_v8, %v2035_v2  ;;  %v3096_v2 = vld [vmem:[#allocation2 + $0x48] sm:$0xff]  ;;  %v3102_v8 = vld [vmem:[#allocation2 + $0x40] sm:$0xff] }
 0x420   :  { %v2041_v10 = vpop.eup %2040  ;;  %3529 = vst [vmem:[#allocation16_spill] sm:$0xff] %v3096_v2  ;;  %3531 = vst [vmem:[#allocation18_spill] sm:$0xff] %v3102_v8 }
 0x421   :  { %v1076_v12 = vmul.f32 %v2041_v10, %v2869_v5  ;;  %v3036_v5 = vld [vmem:[#allocation2 + $0xe8] sm:$0xff] }
 0x422   :  { %v2043_v15 = vpop.eup %2042  ;;  %v3108_v10 = vld [vmem:[#allocation2 + $0x28] sm:$0xff] }
 0x423   :  { %v2991_v13 = vadd.f32 %v1077_v9, %v1076_v12  ;;  %v3105_v9 = vld [vmem:[#allocation2 + $0x50] sm:$0xff]  ;;  %3533 = vst [vmem:[#allocation20_spill] sm:$0xff] %v3108_v10  ;;  %v3114_v12 = vld [vmem:[#allocation2 + $0x20] sm:$0xff] }
 0x424   :  { %3532 = vst [vmem:[#allocation19_spill] sm:$0xff] %v3105_v9  ;;  %3535 = vst [vmem:[#allocation22_spill] sm:$0xff] %v3114_v12 }
 0x425   :  { %2044 = vtanh.f32 %v2991_v13 }
 0x432   :  { %v2045_v16 = vpop.eup %2044 }
 0x433   :  { %v1080_v17 = vmul.f32 %v2045_v16, %v2043_v15  ;;  %v3117_v15 = vld [vmem:[#allocation2 + $0x30] sm:$0xff]  ;;  %v3120_v16 = vld [vmem:[#allocation2 + $0x8] sm:$0xff] }
 0x434   :  { %3536 = vst [vmem:[#allocation23_spill] sm:$0xff] %v3117_v15  ;;  %3537 = vst [vmem:[#allocation24_spill] sm:$0xff] %v3120_v16 }
 0x435   :  { %1146 = vmatmul.mubr.f32.vlgmr.msra.gmra.mxu0 %v1080_v17  ;;  %1217 = vmatmul.mubr.f32.vlgmr.msra.gmra.mxu1 %v1080_v17  ;;  %v3123_v17 = vld [vmem:[#allocation2 + $0x18] sm:$0xff] }
 0x436   :  { %1252 = vmatpush1.msra.mxu0 %v2872_v41  ;;  %1323 = vmatpush1.msra.mxu1 %v2875_v62  ;;  %3538 = vst [vmem:[#allocation25_spill] sm:$0xff] %v3123_v17 }
 0x437   :  { %1253 = vmatprep.subr.mxu0 %v2878_v61  ;;  %1324 = vmatprep.subr.mxu1 %v2881_v3 }
 0x438   :  { %1254 = vmatpush1.msra.mxu0 %v2884_v56  ;;  %1325 = vmatpush1.msra.mxu1 %v2887_v59 }
 0x439   :  { %1255 = vmatprep.subr.mxu0 %v2890_v60  ;;  %1326 = vmatprep.subr.mxu1 %v2893_v1 }
 0x43a   :  { %1256 = vmatpush1.msra.mxu0 %v2896_v58  ;;  %1327 = vmatpush1.msra.mxu1 %v2899_v55 }
 0x43b   :  { %1257 = vmatprep.subr.mxu0 %v2902_v63  ;;  %1328 = vmatprep.subr.mxu1 %v2905_v7 }
 0x43c   :  { %1258 = vmatpush1.msra.mxu0 %v2908_v6  ;;  %1329 = vmatpush1.msra.mxu1 %v2911_v14 }
 0x43d   :  { %1259 = vmatprep.subr.mxu0 %v2914_v4  ;;  %1330 = vmatprep.subr.mxu1 %v2917_v30 }
 0x43e   :  { %1260 = vmatpush1.msra.mxu0 %v3522_v18  ;;  %1331 = vmatpush1.msra.mxu1 %v3523_v19 }
 0x43f   :  { %1261 = vmatprep.subr.mxu0 %v2926_v34  ;;  %1332 = vmatprep.subr.mxu1 %v2929_v50 }
 0x440   :  { %1262 = vmatpush1.msra.mxu0 %v2932_v0  ;;  %1333 = vmatpush1.msra.mxu1 %v2935_v57 }
 0x441   :  { %1263 = vmatprep.subr.mxu0 %v2938_v31  ;;  %1334 = vmatprep.subr.mxu1 %v2941_v33 }
 0x442   :  { %1264 = vmatpush1.msra.mxu0 %v3018_v20  ;;  %1335 = vmatpush1.msra.mxu1 %v3021_v21 }
 0x443   :  { %1265 = vmatprep.subr.mxu0 %v3024_v22  ;;  %1336 = vmatprep.subr.mxu1 %v3027_v24 }
 0x444   :  { %1266 = vmatpush1.msra.mxu0 %v3030_v25  ;;  %1337 = vmatpush1.msra.mxu1 %v3033_v27 }
 0x445   :  { %1267 = vmatprep.subr.mxu0 %v3036_v5  ;;  %1338 = vmatprep.subr.mxu1 %v3039_v35 }
 0x446   :  { %1268 = vmatpush1.msra.mxu0 %v3042_v36  ;;  %1339 = vmatpush1.msra.mxu1 %v3045_v37 }
 0x447   :  { %1269 = vmatprep.subr.mxu0 %v3048_v38  ;;  %1340 = vmatprep.subr.mxu1 %v3051_v39 }
 0x448   :  { %1270 = vmatpush1.msra.mxu0 %v3054_v40  ;;  %1341 = vmatpush1.msra.mxu1 %v3057_v42 }
 0x449   :  { %1271 = vmatprep.subr.mxu0 %v3060_v43  ;;  %1342 = vmatprep.subr.mxu1 %v3063_v44 }
 0x44a   :  { %1272 = vmatpush1.msra.mxu0 %v3066_v45  ;;  %1343 = vmatpush1.msra.mxu1 %v3069_v46 }
 0x44b   :  { %1273 = vmatprep.subr.mxu0 %v3072_v47  ;;  %1344 = vmatprep.subr.mxu1 %v3075_v48 }
 0x44c   :  { %1274 = vmatpush1.msra.mxu0 %v3078_v49  ;;  %1345 = vmatpush1.msra.mxu1 %v3081_v51 }
 0x44d   :  { %1275 = vmatprep.subr.mxu0 %v3084_v52  ;;  %1346 = vmatprep.subr.mxu1 %v3087_v53  ;;  %v3544_v53 = vld [vmem:[#allocation46_spill] sm:$0xff] }
 0x44e   :  { %1276 = vmatpush1.msra.mxu0 %v3090_v54  ;;  %1347 = vmatpush1.msra.mxu1 %v3093_v23  ;;  %v3543_v54 = vld [vmem:[#allocation48_spill] sm:$0xff] }
 0x44f   :  { %1277 = vmatprep.subr.mxu0 %v3096_v2  ;;  %1348 = vmatprep.subr.mxu1 %v3099_v32 }
 0x450   :  { %1278 = vmatpush1.msra.mxu0 %v3102_v8  ;;  %1349 = vmatpush1.msra.mxu1 %v3105_v9  ;;  %v3542_v8 = vld [vmem:[#allocation47_spill] sm:$0xff] }
 0x451   :  { %1279 = vmatprep.subr.mxu0 %v3108_v10  ;;  %1350 = vmatprep.subr.mxu1 %v3111_v11  ;;  %v3126_v10 = vld [vmem:[#allocation2] sm:$0xff]  ;;  %v3130_v11 = vld [vmem:[#allocation2 + $0x10] sm:$0xff] }
 0x452   :  { %1280 = vmatpush1.msra.mxu0 %v3114_v12  ;;  %1351 = vmatpush1.msra.mxu1 %v3117_v15  ;;  %3539 = vst [vmem:[#allocation26_spill] sm:$0xff] %v3126_v10  ;;  %3540 = vst [vmem:[#allocation27_spill] sm:$0xff] %v3130_v11  ;;  %v3541_v15 = vld [vmem:[#allocation45_spill] sm:$0xff] }
 0x453   :  { %1281 = vmatprep.subr.mxu0 %v3120_v16  ;;  %1352 = vmatprep.subr.mxu1 %v3123_v17 }
 0x454   :  { %1282 = vmatpush1.msra.mxu0 %v3126_v10  ;;  %1315 = vmatprep.mubr.f32.mxu0 %v3508_v26 }
 0x455   :  { %1353 = vmatpush1.msra.mxu1 %v3130_v11  ;;  %1386 = vmatprep.mubr.f32.mxu1 %v3508_v26 }
 0x456   :  { %1421 = vmatprep.subr.mxu0 %v2858_v28  ;;  %1492 = vmatprep.subr.mxu1 %v2861_v29 }
 0x4f5   :  { %v1147_v16 = vpop.f32.mrf.mxu0  ;;  %v1218_v10 = vpop.f32.mrf.mxu1 }
 0x4f6   :  { %v1223_v12 = vadd.f32 %v1147_v16, %v3541_v15  ;;  %v1225_v26 = vadd.f32 %v1218_v10, %v3544_v53  ;;  %v3550_v10 = vld [vmem:[#allocation16_spill] sm:$0xff] }
 0x4f7   :  { %v1149_v17 = vpop.f32.mrf.mxu0  ;;  %v1220_v23 = vpop.f32.mrf.mxu1 }
 0x4f8   :  { %v1908_v9 = vmul.f32 -1.442695, %v1223_v12  ;;  %v1224_v32 = vadd.f32 %v1149_v17, %v3542_v8  ;;  %v1226_v11 = vadd.f32 %v1220_v23, %v3543_v54  ;;  %v3549_v23 = vld [vmem:[#allocation34_spill] sm:$0xff] }
 0x4fa   :  { %2046 = vpow2.f32 %v1908_v9  ;;  %v1909_v2 = vmul.f32 -1.442695, %v1224_v32  ;;  %v1910_v52 = vmul.f32 -1.442695, %v1226_v11  ;;  %v3551_v11 = vld [vmem:[#allocation17_spill] sm:$0xff] }
 0x4fc   :  { %2048 = vpow2.f32 %v1909_v2 }
 0x4fd   :  { %2050 = vtanh.f32 %v1225_v26 }
 0x4fe   :  { %2052 = vpow2.f32 %v1910_v52  ;;  %v3548_v52 = vld [vmem:[#allocation36_spill] sm:$0xff] }
 0x507   :  { %v2047_v28 = vpop.eup %2046 }
 0x508   :  { %v1230_v51 = vadd.f32 1.0, %v2047_v28 }
 0x509   :  { %v2049_v29 = vpop.eup %2048 }
 0x50a   :  { %2054 = vrcp.f32 %v1230_v51  ;;  %v1236_v15 = vadd.f32 1.0, %v2049_v29  ;;  %v2051_v12 = vpop.eup %2050  ;;  %v3545_v29 = vld [vmem:[#allocation12_spill] sm:$0xff]  ;;  %v3547_v51 = vld [vmem:[#allocation35_spill] sm:$0xff] }
 0x50b   :  { %v2053_v8 = vpop.eup %2052 }
 0x50c   :  { %2056 = vrcp.f32 %v1236_v15  ;;  %v1243_v2 = vadd.f32 1.0, %v2053_v8  ;;  %v3552_v15 = vld [vmem:[#allocation18_spill] sm:$0xff]  ;;  %v3554_v8 = vld [vmem:[#allocation20_spill] sm:$0xff] }
 0x50e   :  { %2058 = vrcp.f32 %v1243_v2  ;;  %v3558_v2 = vld [vmem:[#allocation24_spill] sm:$0xff] }
 0x517   :  { %v2055_v9 = vpop.eup %2054 }
 0x518   :  { %v1247_v16 = vmul.f32 %v2055_v9, %v2051_v12  ;;  %v3553_v12 = vld [vmem:[#allocation19_spill] sm:$0xff]  ;;  %v3555_v9 = vld [vmem:[#allocation21_spill] sm:$0xff] }
 0x519   :  { %v2057_v32 = vpop.eup %2056 }
 0x51a   :  { %v1246_v17 = vmul.f32 %v2057_v32, %v2991_v13  ;;  %v3546_v13 = vld [vmem:[#allocation33_spill] sm:$0xff]  ;;  %v3557_v32 = vld [vmem:[#allocation23_spill] sm:$0xff] }
 0x51b   :  { %v2059_v28 = vpop.eup %2058 }
 0x51c   :  { %v3141_v54 = vadd.f32 %v1247_v16, %v1246_v17  ;;  %v3556_v16 = vld [vmem:[#allocation22_spill] sm:$0xff]  ;;  %v3559_v17 = vld [vmem:[#allocation25_spill] sm:$0xff] }
 0x51e   :  { %2060 = vtanh.f32 %v3141_v54 }
 0x52b   :  { %v2061_v26 = vpop.eup %2060 }
 0x52c   :  { %v1250_v53 = vmul.f32 %v2061_v26, %v2059_v28  ;;  %v3560_v28 = vld [vmem:[#allocation26_spill] sm:$0xff]  ;;  %v3561_v26 = vmov 0.0  }
 0x52e   :  { %1316 = vmatmul.mubr.f32.vlgmr.msra.gmra.mxu0 %v1250_v53  ;;  %1387 = vmatmul.mubr.f32.vlgmr.msra.gmra.mxu1 %v1250_v53  ;;  %v3562_v53 = vld [vmem:[#allocation27_spill] sm:$0xff] }
 0x52f   :  { %1422 = vmatpush1.msra.mxu0 %v2872_v41  ;;  %1493 = vmatpush1.msra.mxu1 %v2875_v62 }
 0x530   :  { %1423 = vmatprep.subr.mxu0 %v2878_v61  ;;  %1494 = vmatprep.subr.mxu1 %v2881_v3 }
 0x531   :  { %1424 = vmatpush1.msra.mxu0 %v2884_v56  ;;  %1495 = vmatpush1.msra.mxu1 %v2887_v59 }
 0x532   :  { %1425 = vmatprep.subr.mxu0 %v2890_v60  ;;  %1496 = vmatprep.subr.mxu1 %v2893_v1 }
 0x533   :  { %1426 = vmatpush1.msra.mxu0 %v2896_v58  ;;  %1497 = vmatpush1.msra.mxu1 %v2899_v55 }
 0x534   :  { %1427 = vmatprep.subr.mxu0 %v2902_v63  ;;  %1498 = vmatprep.subr.mxu1 %v2905_v7 }
 0x535   :  { %1428 = vmatpush1.msra.mxu0 %v2908_v6  ;;  %1499 = vmatpush1.msra.mxu1 %v2911_v14 }
 0x536   :  { %1429 = vmatprep.subr.mxu0 %v2914_v4  ;;  %1500 = vmatprep.subr.mxu1 %v2917_v30 }
 0x537   :  { %1430 = vmatpush1.msra.mxu0 %v3522_v18  ;;  %1501 = vmatpush1.msra.mxu1 %v3523_v19 }
 0x538   :  { %1431 = vmatprep.subr.mxu0 %v2926_v34  ;;  %1502 = vmatprep.subr.mxu1 %v2929_v50 }
 0x539   :  { %1432 = vmatpush1.msra.mxu0 %v2932_v0  ;;  %1503 = vmatpush1.msra.mxu1 %v2935_v57 }
 0x53a   :  { %1433 = vmatprep.subr.mxu0 %v2938_v31  ;;  %1504 = vmatprep.subr.mxu1 %v2941_v33 }
 0x53b   :  { %1434 = vmatpush1.msra.mxu0 %v3018_v20  ;;  %1505 = vmatpush1.msra.mxu1 %v3021_v21 }
 0x53c   :  { %1435 = vmatprep.subr.mxu0 %v3024_v22  ;;  %1506 = vmatprep.subr.mxu1 %v3027_v24 }
 0x53d   :  { %1436 = vmatpush1.msra.mxu0 %v3030_v25  ;;  %1507 = vmatpush1.msra.mxu1 %v3033_v27 }
 0x53e   :  { %1437 = vmatprep.subr.mxu0 %v3036_v5  ;;  %1508 = vmatprep.subr.mxu1 %v3039_v35 }
 0x53f   :  { %1438 = vmatpush1.msra.mxu0 %v3042_v36  ;;  %1509 = vmatpush1.msra.mxu1 %v3045_v37 }
 0x540   :  { %1439 = vmatprep.subr.mxu0 %v3048_v38  ;;  %1510 = vmatprep.subr.mxu1 %v3051_v39 }
 0x541   :  { %1440 = vmatpush1.msra.mxu0 %v3054_v40  ;;  %1511 = vmatpush1.msra.mxu1 %v3057_v42 }
 0x542   :  { %1441 = vmatprep.subr.mxu0 %v3060_v43  ;;  %1512 = vmatprep.subr.mxu1 %v3063_v44 }
 0x543   :  { %1442 = vmatpush1.msra.mxu0 %v3066_v45  ;;  %1513 = vmatpush1.msra.mxu1 %v3069_v46 }
 0x544   :  { %1443 = vmatprep.subr.mxu0 %v3072_v47  ;;  %1514 = vmatprep.subr.mxu1 %v3075_v48 }
 0x545   :  { %1444 = vmatpush1.msra.mxu0 %v3078_v49  ;;  %1515 = vmatpush1.msra.mxu1 %v3545_v29 }
 0x546   :  { %1445 = vmatprep.subr.mxu0 %v3546_v13  ;;  %1516 = vmatprep.subr.mxu1 %v3547_v51  ;;  %v3568_v51 = vld [vmem:[#allocation50_spill] sm:$0xff] }
 0x547   :  { %1446 = vmatpush1.msra.mxu0 %v3548_v52  ;;  %1517 = vmatpush1.msra.mxu1 %v3549_v23  ;;  %v3567_v52 = vld [vmem:[#allocation52_spill] sm:$0xff] }
 0x548   :  { %1447 = vmatprep.subr.mxu0 %v3550_v10  ;;  %1518 = vmatprep.subr.mxu1 %v3551_v11 }
 0x549   :  { %1448 = vmatpush1.msra.mxu0 %v3552_v15  ;;  %1519 = vmatpush1.msra.mxu1 %v3553_v12  ;;  %v3563_v12 = vld [vmem:[#allocation13_spill] sm:$0xff] }
 0x54a   :  { %1449 = vmatprep.subr.mxu0 %v3554_v8  ;;  %1520 = vmatprep.subr.mxu1 %v3555_v9  ;;  %v3564_v8 = vld [vmem:[#allocation14_spill] sm:$0xff] }
 0x54b   :  { %1450 = vmatpush1.msra.mxu0 %v3556_v16  ;;  %1521 = vmatpush1.msra.mxu1 %v3557_v32  ;;  %v3565_v16 = vld [vmem:[#allocation49_spill] sm:$0xff] }
 0x54c   :  { %1451 = vmatprep.subr.mxu0 %v3558_v2  ;;  %1522 = vmatprep.subr.mxu1 %v3559_v17  ;;  %v3566_v2 = vld [vmem:[#allocation51_spill] sm:$0xff] }
 0x54d   :  { %1452 = vmatpush1.msra.mxu0 %v3560_v28  ;;  %1485 = vmatprep.mubr.f32.mxu0 %v3561_v26 }
 0x54e   :  { %1523 = vmatpush1.msra.mxu1 %v3562_v53  ;;  %1556 = vmatprep.mubr.f32.mxu1 %v3561_v26 }
 0x54f   :  { %1591 = vmatprep.subr.mxu0 %v3563_v12  ;;  %1662 = vmatprep.subr.mxu1 %v3564_v8 }
 0x5ee   :  { %v1317_v9 = vpop.f32.mrf.mxu0  ;;  %v1388_v17 = vpop.f32.mrf.mxu1 }
 0x5ef   :  { %v1393_v15 = vadd.f32 %v1317_v9, %v3565_v16  ;;  %v1395_v26 = vadd.f32 %v1388_v17, %v3568_v51 }
 0x5f0   :  { %v1319_v32 = vpop.f32.mrf.mxu0  ;;  %v1390_v23 = vpop.f32.mrf.mxu1 }
 0x5f1   :  { %v1911_v11 = vmul.f32 -1.442695, %v1393_v15  ;;  %v1394_v10 = vadd.f32 %v1319_v32, %v3566_v2  ;;  %v1396_v53 = vadd.f32 %v1390_v23, %v3567_v52 }
 0x5f3   :  { %2062 = vpow2.f32 %v1911_v11  ;;  %v1912_v28 = vmul.f32 -1.442695, %v1394_v10  ;;  %v1913_v13 = vmul.f32 -1.442695, %v1396_v53  ;;  %v1775_v53 = vld [vmem:[#allocation5 + $0x70] sm:$0xff] }
 0x5f5   :  { %2064 = vpow2.f32 %v1912_v28 }
 0x5f6   :  { %2066 = vtanh.f32 %v1395_v26  ;;  %v1776_v26 = vld [vmem:[#allocation5 + $0x78] sm:$0xff] }
 0x5f7   :  { %2068 = vpow2.f32 %v1913_v13 }
 0x600   :  { %v2063_v12 = vpop.eup %2062 }
 0x601   :  { %v1400_v29 = vadd.f32 1.0, %v2063_v12  ;;  %v1774_v12 = vld [vmem:[#allocation5 + $0x68] sm:$0xff] }
 0x602   :  { %v2065_v8 = vpop.eup %2064 }
 0x603   :  { %2070 = vrcp.f32 %v1400_v29  ;;  %v1406_v9 = vadd.f32 1.0, %v2065_v8  ;;  %v2067_v15 = vpop.eup %2066  ;;  %v1773_v8 = vld [vmem:[#allocation5 + $0x60] sm:$0xff] }
 0x604   :  { %v2069_v16 = vpop.eup %2068 }
 0x605   :  { %2072 = vrcp.f32 %v1406_v9  ;;  %v1413_v2 = vadd.f32 1.0, %v2069_v16  ;;  %v1772_v9 = vld [vmem:[#allocation5 + $0x58] sm:$0xff]  ;;  %v1770_v16 = vld [vmem:[#allocation5 + $0x48] sm:$0xff] }
 0x607   :  { %2074 = vrcp.f32 %v1413_v2  ;;  %v1766_v2 = vld [vmem:[#allocation5 + $0x28] sm:$0xff] }
 0x610   :  { %v2071_v11 = vpop.eup %2070 }
 0x611   :  { %v1417_v32 = vmul.f32 %v2071_v11, %v2067_v15  ;;  %v1771_v15 = vld [vmem:[#allocation5 + $0x50] sm:$0xff]  ;;  %v1769_v11 = vld [vmem:[#allocation5 + $0x40] sm:$0xff] }
 0x612   :  { %v2073_v10 = vpop.eup %2072 }
 0x613   :  { %v1416_v28 = vmul.f32 %v2073_v10, %v3141_v54  ;;  %v1767_v10 = vld [vmem:[#allocation5 + $0x30] sm:$0xff] }
 0x614   :  { %v2075_v51 = vpop.eup %2074 }
 0x615   :  { %v3215_v52 = vadd.f32 %v1417_v32, %v1416_v28  ;;  %v1768_v32 = vld [vmem:[#allocation5 + $0x38] sm:$0xff]  ;;  %v1765_v28 = vld [vmem:[#allocation5 + $0x20] sm:$0xff] }
 0x617   :  { %2076 = vtanh.f32 %v3215_v52 }
 0x624   :  { %v2077_v23 = vpop.eup %2076 }
 0x625   :  { %v1420_v17 = vmul.f32 %v2077_v23, %v2075_v51  ;;  %v1763_v51 = vld [vmem:[#allocation5 + $0x10] sm:$0xff]  ;;  %v1762_v23 = vld [vmem:[#allocation5 + $0x8] sm:$0xff] }
 0x627   :  { %1486 = vmatmul.mubr.f32.vlgmr.msra.gmra.mxu0 %v1420_v17  ;;  %1557 = vmatmul.mubr.f32.vlgmr.msra.gmra.mxu1 %v1420_v17  ;;  %v1761_v17 = vld [vmem:[#allocation5] sm:$0xff] }
 0x628   :  { %1592 = vmatpush1.msra.mxu0 %v2872_v41  ;;  %1663 = vmatpush1.msra.mxu1 %v2875_v62  ;;  %v3569_v41 = vld [vmem:[#allocation12_spill] sm:$0xff]  ;;  %v3570_v62 = vld [vmem:[#allocation33_spill] sm:$0xff] }
 0x629   :  { %1593 = vmatprep.subr.mxu0 %v2878_v61  ;;  %1664 = vmatprep.subr.mxu1 %v2881_v3  ;;  %v3571_v61 = vld [vmem:[#allocation35_spill] sm:$0xff]  ;;  %v3572_v3 = vld [vmem:[#allocation36_spill] sm:$0xff] }
 0x62a   :  { %1594 = vmatpush1.msra.mxu0 %v2884_v56  ;;  %1665 = vmatpush1.msra.mxu1 %v2887_v59  ;;  %v3573_v56 = vld [vmem:[#allocation34_spill] sm:$0xff]  ;;  %v3574_v59 = vld [vmem:[#allocation16_spill] sm:$0xff] }
 0x62b   :  { %1595 = vmatprep.subr.mxu0 %v2890_v60  ;;  %1666 = vmatprep.subr.mxu1 %v2893_v1  ;;  %v3575_v60 = vld [vmem:[#allocation17_spill] sm:$0xff]  ;;  %v3576_v1 = vld [vmem:[#allocation18_spill] sm:$0xff] }
 0x62c   :  { %1596 = vmatpush1.msra.mxu0 %v2896_v58  ;;  %1667 = vmatpush1.msra.mxu1 %v2899_v55  ;;  %v3577_v58 = vld [vmem:[#allocation19_spill] sm:$0xff]  ;;  %v3578_v55 = vld [vmem:[#allocation20_spill] sm:$0xff] }
 0x62d   :  { %1597 = vmatprep.subr.mxu0 %v2902_v63  ;;  %1668 = vmatprep.subr.mxu1 %v2905_v7  ;;  %v3579_v63 = vld [vmem:[#allocation21_spill] sm:$0xff]  ;;  %v3580_v7 = vld [vmem:[#allocation22_spill] sm:$0xff] }
 0x62e   :  { %1598 = vmatpush1.msra.mxu0 %v2908_v6  ;;  %1669 = vmatpush1.msra.mxu1 %v2911_v14  ;;  %v3581_v6 = vld [vmem:[#allocation23_spill] sm:$0xff]  ;;  %v3582_v14 = vld [vmem:[#allocation24_spill] sm:$0xff] }
 0x62f   :  { %1599 = vmatprep.subr.mxu0 %v2914_v4  ;;  %1670 = vmatprep.subr.mxu1 %v2917_v30  ;;  %v3583_v4 = vld [vmem:[#allocation25_spill] sm:$0xff]  ;;  %v3584_v30 = vld [vmem:[#allocation26_spill] sm:$0xff] }
 0x630   :  { %1600 = vmatpush1.msra.mxu0 %v3522_v18  ;;  %1671 = vmatpush1.msra.mxu1 %v3523_v19  ;;  %v3588_v19 = vld [vmem:[#allocation55_spill] sm:$0xff] }
 0x631   :  { %1601 = vmatprep.subr.mxu0 %v2926_v34  ;;  %1672 = vmatprep.subr.mxu1 %v2929_v50  ;;  %v3587_v50 = vld [vmem:[#allocation53_spill] sm:$0xff] }
 0x632   :  { %1602 = vmatpush1.msra.mxu0 %v2932_v0  ;;  %1673 = vmatpush1.msra.mxu1 %v2935_v57 }
 0x633   :  { %1603 = vmatprep.subr.mxu0 %v2938_v31  ;;  %1674 = vmatprep.subr.mxu1 %v2941_v33  ;;  %v3585_v31 = vmov 0.0   ;;  %v3586_v33 = vld [vmem:[#allocation27_spill] sm:$0xff] }
 0x634   :  { %1604 = vmatpush1.msra.mxu0 %v3018_v20  ;;  %1675 = vmatpush1.msra.mxu1 %v3021_v21 }
 0x635   :  { %1605 = vmatprep.subr.mxu0 %v3024_v22  ;;  %1676 = vmatprep.subr.mxu1 %v3027_v24 }
 0x636   :  { %1606 = vmatpush1.msra.mxu0 %v3030_v25  ;;  %1677 = vmatpush1.msra.mxu1 %v3033_v27  ;;  %v3589_v25 = vld [vmem:[#allocation56_spill] sm:$0xff] }
 0x637   :  { %1607 = vmatprep.subr.mxu0 %v3036_v5  ;;  %1678 = vmatprep.subr.mxu1 %v3039_v35  ;;  %v3590_v5 = vld [vmem:[#allocation54_spill] sm:$0xff] }
 0x638   :  { %1608 = vmatpush1.msra.mxu0 %v3042_v36  ;;  %1679 = vmatpush1.msra.mxu1 %v3045_v37 }
 0x639   :  { %1609 = vmatprep.subr.mxu0 %v3048_v38  ;;  %1680 = vmatprep.subr.mxu1 %v3051_v39 }
 0x63a   :  { %1610 = vmatpush1.msra.mxu0 %v3054_v40  ;;  %1681 = vmatpush1.msra.mxu1 %v3057_v42 }
 0x63b   :  { %1611 = vmatprep.subr.mxu0 %v3060_v43  ;;  %1682 = vmatprep.subr.mxu1 %v3063_v44 }
 0x63c   :  { %1612 = vmatpush1.msra.mxu0 %v3066_v45  ;;  %1683 = vmatpush1.msra.mxu1 %v3069_v46 }
 0x63d   :  { %1613 = vmatprep.subr.mxu0 %v3072_v47  ;;  %1684 = vmatprep.subr.mxu1 %v3075_v48 }
 0x63e   :  { %1614 = vmatpush1.msra.mxu0 %v3078_v49  ;;  %1685 = vmatpush1.msra.mxu1 %v3569_v41 }
 0x63f   :  { %1615 = vmatprep.subr.mxu0 %v3570_v62  ;;  %1686 = vmatprep.subr.mxu1 %v3571_v61  ;;  %v3591_v62 = vld [vmem:[#allocation57_spill] sm:$0xff] }
 0x640   :  { %1616 = vmatpush1.msra.mxu0 %v3572_v3  ;;  %1687 = vmatpush1.msra.mxu1 %v3573_v56 }
 0x641   :  { %1617 = vmatprep.subr.mxu0 %v3574_v59  ;;  %1688 = vmatprep.subr.mxu1 %v3575_v60  ;;  %v3592_v59 = vld [vmem:[#allocation59_spill] sm:$0xff] }
 0x642   :  { %1618 = vmatpush1.msra.mxu0 %v3576_v1  ;;  %1689 = vmatpush1.msra.mxu1 %v3577_v58 }
 0x643   :  { %1619 = vmatprep.subr.mxu0 %v3578_v55  ;;  %1690 = vmatprep.subr.mxu1 %v3579_v63  ;;  %v3593_v63 = vld [vmem:[#allocation60_spill] sm:$0xff] }
 0x644   :  { %1620 = vmatpush1.msra.mxu0 %v3580_v7  ;;  %1691 = vmatpush1.msra.mxu1 %v3581_v6  ;;  %v3594_v6 = vld [vmem:[#allocation58_spill] sm:$0xff] }
 0x645   :  { %1621 = vmatprep.subr.mxu0 %v3582_v14  ;;  %1692 = vmatprep.subr.mxu1 %v3583_v4 }
 0x646   :  { %1622 = vmatpush1.msra.mxu0 %v3584_v30  ;;  %1655 = vmatprep.mubr.f32.mxu0 %v3585_v31 }
 0x647   :  { %1693 = vmatpush1.msra.mxu1 %v3586_v33  ;;  %1726 = vmatprep.mubr.f32.mxu1 %v3585_v31 }
 0x648   :  { %1938 = vmatprep.subr.mxu0 %v3585_v31 }
 0x6e7   :  { %v1487_v34 = vpop.f32.mrf.mxu0  ;;  %v1558_v21 = vpop.f32.mrf.mxu1 }
 0x6e8   :  { %v1563_v0 = vadd.f32 %v1487_v34, %v3587_v50  ;;  %v1565_v35 = vadd.f32 %v1558_v21, %v3590_v5  ;;  %v1920_v5 = vld [vmem:[%s3323_s5] ss:$0 sm:$0xff] }
 0x6e9   :  { %v1489_v57 = vpop.f32.mrf.mxu0  ;;  %v1560_v24 = vpop.f32.mrf.mxu1 }
 0x6ea   :  { %v1914_v18 = vmul.f32 -1.442695, %v1563_v0  ;;  %v1564_v20 = vadd.f32 %v1489_v57, %v3588_v19  ;;  %v1566_v27 = vadd.f32 %v1560_v24, %v3589_v25 }
 0x6ec   :  { %2078 = vpow2.f32 %v1914_v18  ;;  %v1915_v22 = vmul.f32 -1.442695, %v1564_v20  ;;  %v1916_v36 = vmul.f32 -1.442695, %v1566_v27 }
 0x6ee   :  { %2080 = vpow2.f32 %v1915_v22 }
 0x6ef   :  { %2082 = vtanh.f32 %v1565_v35 }
 0x6f0   :  { %2084 = vpow2.f32 %v1916_v36 }
 0x6f9   :  { %v2079_v37 = vpop.eup %2078 }
 0x6fa   :  { %v1570_v38 = vadd.f32 1.0, %v2079_v37 }
 0x6fb   :  { %v2081_v39 = vpop.eup %2080 }
 0x6fc   :  { %2086 = vrcp.f32 %v1570_v38  ;;  %v1576_v40 = vadd.f32 1.0, %v2081_v39  ;;  %v2083_v42 = vpop.eup %2082 }
 0x6fd   :  { %v2085_v43 = vpop.eup %2084 }
 0x6fe   :  { %2088 = vrcp.f32 %v1576_v40  ;;  %v1583_v47 = vadd.f32 1.0, %v2085_v43 }
 0x700   :  { %2090 = vrcp.f32 %v1583_v47 }
 0x709   :  { %v2087_v44 = vpop.eup %2086 }
 0x70a   :  { %v1587_v45 = vmul.f32 %v2087_v44, %v2083_v42 }
 0x70b   :  { %v2089_v46 = vpop.eup %2088 }
 0x70c   :  { %v1586_v48 = vmul.f32 %v2089_v46, %v3215_v52  ;;  %v1764_v52 = vld [vmem:[#allocation5 + $0x18] sm:$0xff] }
 0x70d   :  { %v2091_v54 = vpop.eup %2090 }
 0x70e   :  { %v3288_v49 = vadd.f32 %v1587_v45, %v1586_v48 }
 0x710   :  { %2092 = vtanh.f32 %v3288_v49 }
 0x71d   :  { %v2093_v29 = vpop.eup %2092 }
 0x71e   :  { %v1590_v13 = vmul.f32 %v2093_v29, %v2091_v54 }
 0x720   :  { %1656 = vmatmul.mubr.f32.vlgmr.msra.gmra.mxu0 %v1590_v13  ;;  %1727 = vmatmul.mubr.f32.vlgmr.msra.gmra.mxu1 %v1590_v13 }
 0x721   :  { %1939 = vmatpush3.msra.mxu0 %v1776_v26  ;;  %1970 = vmatprep.mubr.msk.f32.mxu0 %vm2251_vm1, %v3585_v31 }
 0x722   :  { %1940 = vmatprep.subr.mxu0 %v3585_v31 }
 0x723   :  { %1941 = vmatpush3.msra.mxu0 %v1775_v53 }
 0x724   :  { %1942 = vmatprep.subr.mxu0 %v3585_v31 }
 0x725   :  { %1943 = vmatpush3.msra.mxu0 %v1774_v12 }
 0x726   :  { %1944 = vmatprep.subr.mxu0 %v3585_v31 }
 0x727   :  { %1945 = vmatpush3.msra.mxu0 %v1773_v8 }
 0x728   :  { %1946 = vmatprep.subr.mxu0 %v3585_v31 }
 0x729   :  { %1947 = vmatpush3.msra.mxu0 %v1772_v9 }
 0x72a   :  { %1948 = vmatprep.subr.mxu0 %v3585_v31 }
 0x72b   :  { %1949 = vmatpush3.msra.mxu0 %v1771_v15 }
 0x72c   :  { %1950 = vmatprep.subr.mxu0 %v3585_v31 }
 0x72d   :  { %1951 = vmatpush3.msra.mxu0 %v1770_v16 }
 0x72e   :  { %1952 = vmatprep.subr.mxu0 %v3585_v31 }
 0x72f   :  { %1953 = vmatpush3.msra.mxu0 %v1769_v11 }
 0x730   :  { %1954 = vmatprep.subr.mxu0 %v3585_v31 }
 0x731   :  { %1955 = vmatpush3.msra.mxu0 %v1768_v32 }
 0x732   :  { %1956 = vmatprep.subr.mxu0 %v3585_v31 }
 0x733   :  { %1957 = vmatpush3.msra.mxu0 %v1767_v10 }
 0x734   :  { %1958 = vmatprep.subr.mxu0 %v3585_v31 }
 0x735   :  { %1959 = vmatpush3.msra.mxu0 %v1766_v2 }
 0x736   :  { %1960 = vmatprep.subr.mxu0 %v3585_v31 }
 0x737   :  { %1961 = vmatpush3.msra.mxu0 %v1765_v28 }
 0x738   :  { %1962 = vmatprep.subr.mxu0 %v3585_v31 }
 0x739   :  { %1963 = vmatpush3.msra.mxu0 %v1764_v52 }
 0x73a   :  { %1964 = vmatprep.subr.mxu0 %v3585_v31 }
 0x73b   :  { %1965 = vmatpush3.msra.mxu0 %v1763_v51 }
 0x73c   :  { %1966 = vmatprep.subr.mxu0 %v3585_v31 }
 0x73d   :  { %1967 = vmatpush3.msra.mxu0 %v1762_v23 }
 0x73e   :  { %1968 = vmatprep.subr.mxu0 %v3585_v31 }
 0x73f   :  { %1969 = vmatpush3.msra.mxu0 %v1761_v17 }
 0x7e0   :  { %v1657_v41 = vpop.f32.mrf.mxu0  ;;  %v1728_v1 = vpop.f32.mrf.mxu1 }
 0x7e1   :  { %v1733_v61 = vadd.f32 %v1657_v41, %v3591_v62  ;;  %v1735_v14 = vadd.f32 %v1728_v1, %v3594_v6 }
 0x7e2   :  { %v1659_v3 = vpop.f32.mrf.mxu0  ;;  %v1730_v55 = vpop.f32.mrf.mxu1 }
 0x7e3   :  { %v1917_v56 = vmul.f32 -1.442695, %v1733_v61  ;;  %v1734_v60 = vadd.f32 %v1659_v3, %v3592_v59  ;;  %v1736_v7 = vadd.f32 %v1730_v55, %v3593_v63 }
 0x7e5   :  { %2094 = vpow2.f32 %v1917_v56  ;;  %v1918_v58 = vmul.f32 -1.442695, %v1734_v60  ;;  %v1919_v4 = vmul.f32 -1.442695, %v1736_v7 }
 0x7e7   :  { %2096 = vpow2.f32 %v1918_v58 }
 0x7e8   :  { %2098 = vtanh.f32 %v1735_v14 }
 0x7e9   :  { %2100 = vpow2.f32 %v1919_v4 }
 0x7f2   :  { %v2095_v30 = vpop.eup %2094 }
 0x7f3   :  { %v1740_v31 = vadd.f32 1.0, %v2095_v30 }
 0x7f4   :  { %v2097_v33 = vpop.eup %2096 }
 0x7f5   :  { %2102 = vrcp.f32 %v1740_v31  ;;  %v1746_v34 = vadd.f32 1.0, %v2097_v33  ;;  %v2099_v50 = vpop.eup %2098 }
 0x7f6   :  { %v2101_v0 = vpop.eup %2100 }
 0x7f7   :  { %2104 = vrcp.f32 %v1746_v34  ;;  %v1753_v20 = vadd.f32 1.0, %v2101_v0 }
 0x7f9   :  { %2106 = vrcp.f32 %v1753_v20 }
 0x802   :  { %v2103_v57 = vpop.eup %2102 }
 0x803   :  { %v1757_v18 = vmul.f32 %v2103_v57, %v2099_v50 }
 0x804   :  { %v2105_v19 = vpop.eup %2104 }
 0x805   :  { %v1756_v21 = vmul.f32 %v2105_v19, %v3288_v49 }
 0x806   :  { %v2107_v24 = vpop.eup %2106 }
 0x807   :  { %v1758_v22 = vadd.f32 %v1757_v18, %v1756_v21 }
 0x809   :  { %2108 = vtanh.f32 %v1758_v22 }
 0x816   :  { %v2109_v25 = vpop.eup %2108 }
 0x817   :  { %v1760_v27 = vmul.f32 %v2109_v25, %v2107_v24 }
 0x819   :  { %1971 = vmatmul.mubr.f32.vlgmr.msra.gmra.mxu0 %v1760_v27 }
 0x8d9   :  { %v1850_v35 = vpop.f32.mrf.mxu0 }
 0x8da   :  { %v1851_v36 = vadd.f32 %v1920_v5, %v1850_v35 }
 0x8db   :  { %v1972_v37 = vpop.f32.mrf.mxu0 }
 0x8dc   :  { %1854 = vmax.xlane.f32.xlu0 %v1851_v36 }
 0x965   :  { %v1855_v38 = vpop.xlane.xlu0 %1854 }
 0x966   :  { %v1856_v39 = vsub.f32 %v1851_v36, %v1855_v38 }
 0x968   :  { %v1857_v40 = vmul.f32 1.442695, %v1856_v39 }
 0x96a   :  { %2110 = vpow2.f32 %v1857_v40 }
 0x977   :  { %v2111_v42 = vpop.eup %2110 }
 0x978   :  { %1859 = vadd.xlane.f32.xlu0 %v2111_v42 }
 0xa01   :  { %v1860_v43 = vpop.xlane.xlu0 %1859 }
 0xa02   :  { %2112 = vrcp.f32 %v1860_v43 }
 0xa0f   :  { %v2113_v44 = vpop.eup %2112 }
 0xa10   :  { %v1862_v45 = vmul.f32 %v2113_v44, %v2111_v42 }
 0xa12   :  { %1863 = vst [vmem:[#allocation7] sm:$0xff] %v1862_v45 }
 0xa13   :  { %2229 = shalt.err (!%p2226_p0)
}
 0xa14   :  { %1873 = dma.vmem_to_hbm [thread:$0]  %s1871_s2, 128, %s3324_s6, [#allocation4]  }
 0xa15   :  { %2242 = dma.done.wait [#allocation4], 128  }
 0xa16   :  { %2243 = vsyncadd [#allocation4], 4294967168 }
 0xa17   :  { %1877 = vsyncpa [#allocation3], 1 }
 0xa18   :  { %1878 = vsyncpa [#allocation6], 1 }
 0xa19   :  { %1879 = vsyncpa [#allocation4], 1 }

</bundles_post_ra>
